<compile_context>
chip_gen: v6e
topology: v6e:2x2x1
jax: 0.10.0
libtpu: 0.0.40
codegen_flags: <defaults>
</compile_context>

<pallas_src>
import functools

import jax
import jax.numpy as jnp
from jax.experimental import pallas as pl
from jax.experimental.pallas import tpu as pltpu


def _layer_norm(x, w, b, eps=1e-5):
    # x: (N, D); w, b: (1, D).  Padded (all-zero) rows give variance 0 -> output == bias;
    # harmless because padded rows are never selected by the EOT gather.
    mean = jnp.mean(x, axis=-1, keepdims=True)
    var = jnp.mean(jnp.square(x - mean), axis=-1, keepdims=True)
    return (x - mean) * jax.lax.rsqrt(var + eps) * w + b


def clip_encoder_kernel(eot_ref,                                   # scalar-prefetch (SMEM), (B,)
                        x0_ref, mask_ref,                          # embeddings, causal mask
                        ln1w_ref, ln1b_ref, wqkv_ref, bqkv_ref,    # per-layer (stacked on depth)
                        wo_ref, bo_ref, ln2w_ref, ln2b_ref,
                        w1_ref, b1_ref, w2_ref, b2_ref,
                        flnw_ref, flnb_ref, tproj_ref,             # tail (final LN + projection)
                        z_ref,                                     # output (Bt, 1, Dp)
                        x_sc,                                      # VMEM residual stream
                        *, heads, dim_head, batch_tile):
    # program ids hoisted out of all pl.when bodies (required for correct lowering).
    bt = pl.program_id(0)
    layer = pl.program_id(1)
    n_layers = pl.num_programs(1)

    Bt = batch_tile
    D = heads * dim_head
    S = x_sc.shape[1]
    scale = dim_head ** -0.5

    # ---- first depth step: load residual stream (token + positional embedding, pre-added) ----
    @pl.when(layer == 0)
    def _():
        x_sc[...] = x0_ref[...]

    # ---- causal self-attention sub-block (pre-norm + residual) ----
    x = x_sc[...]                                                  # (Bt, S, D) fp32
    x2 = x.reshape(Bt * S, D)
    xn = _layer_norm(x2, ln1w_ref[0], ln1b_ref[0]).astype(jnp.bfloat16)
    qkv = jnp.dot(xn, wqkv_ref[0], preferred_element_type=jnp.float32) + bqkv_ref[0]
    q = (qkv[:, :D] * scale).reshape(Bt, S, D)                     # scale hoisted out of head loop
    k = qkv[:, D:2 * D].reshape(Bt, S, D)
    v = qkv[:, 2 * D:].reshape(Bt, S, D)
    mask = mask_ref[...]                                           # additive causal mask (S, S)
    wo = wo_ref[0]                                                 # (D, D) bf16
    bo = bo_ref[0]                                                 # (1, D) fp32

    for b in range(Bt):                                            # static, small
        attn_b = jnp.zeros((S, D), jnp.float32)
        for h in range(heads):                                     # static, static offsets
            lo = h * dim_head
            hi = lo + dim_head
            qh = q[b, :, lo:hi].astype(jnp.bfloat16)
            kh = k[b, :, lo:hi].astype(jnp.bfloat16)
            vh = v[b, :, lo:hi].astype(jnp.bfloat16)
            s = jax.lax.dot_general(qh, kh, (((1,), (1,)), ((), ())),
                                    preferred_element_type=jnp.float32)      # (S, S)
            s = s + mask
            s = s - jnp.max(s, axis=-1, keepdims=True)
            p = jnp.exp(s)
            p = p * (1.0 / jnp.sum(p, axis=-1, keepdims=True))
            oh = jnp.dot(p.astype(jnp.bfloat16), vh,
                         preferred_element_type=jnp.float32)                 # (S, dh)
            # fold head output straight through the matching rows of the out projection
            attn_b = attn_b + jnp.dot(oh.astype(jnp.bfloat16), wo[lo:hi, :],
                                      preferred_element_type=jnp.float32)
        x_sc[b] = x[b] + attn_b + bo

    # ---- MLP sub-block (pre-norm + residual, QuickGELU) ----
    x = x_sc[...]
    x2 = x.reshape(Bt * S, D)
    xn2 = _layer_norm(x2, ln2w_ref[0], ln2b_ref[0]).astype(jnp.bfloat16)
    h1 = jnp.dot(xn2, w1_ref[0], preferred_element_type=jnp.float32) + b1_ref[0]
    h1 = h1 * (0.5 * (jnp.tanh(0.851 * h1) + 1.0))                 # x * sigmoid(1.702 x)
    ff = jnp.dot(h1.astype(jnp.bfloat16), w2_ref[0],
                 preferred_element_type=jnp.float32) + b2_ref[0]
    x_sc[...] = (x2 + ff).reshape(Bt, S, D)

    # ---- last depth step: ln_final on EOT rows, text projection, L2 normalize ----
    @pl.when(layer == n_layers - 1)
    def _():
        rows = []
        for i in range(Bt):
            e = eot_ref[bt * Bt + i]                               # scalar SMEM read
            rows.append(x_sc[i, pl.ds(e, 1), :])                   # (1, D) dynamic EOT-row read
        feat = rows[0] if Bt == 1 else jnp.concatenate(rows, axis=0)   # (Bt, D)
        feat = _layer_norm(feat, flnw_ref[...], flnb_ref[...])
        zb = jnp.dot(feat.astype(jnp.bfloat16), tproj_ref[...],
                     preferred_element_type=jnp.float32)           # (Bt, Dp)
        zb = zb * jax.lax.rsqrt(jnp.sum(zb * zb, axis=-1, keepdims=True))   # exact L2 normalize
        z_ref[...] = zb[:, None, :]


def clip_text_embedder_forward(tokens, params, *, heads, dim_head,
                               batch_tile=None, seq_align=16):
    """FrozenCLIPTextEmbedder.forward: token ids (B, S) int32 -> normalized embeddings (B, Dp)."""
    B, S = tokens.shape
    D = params['tok_emb'].shape[1]
    Dp = params['text_projection'].shape[1]
    depth = params['wqkv'].shape[0]
    S_pad = ((S + seq_align - 1) // seq_align) * seq_align

    if batch_tile is None:
        batch_tile = min(B, 4)
        while B % batch_tile != 0:
            batch_tile -= 1
    Bt = batch_tile
    assert B % Bt == 0

    # TODO(synk): clip.tokenize (host-side BPE text tokenizer) has no Pallas equivalent;
    #             the kernel consumes already-tokenized ids.
    # TODO(synk): token-embedding gather is a data-dependent vocab lookup; kept in plain JAX.
    x0 = params['tok_emb'][tokens] + params['pos_emb'][:S][None]   # (B, S, D) fp32
    x0 = jnp.pad(x0, ((0, 0), (0, S_pad - S), (0, 0))).astype(jnp.float32)
    eot = jnp.argmax(tokens, axis=-1).astype(jnp.int32)            # CLIP: EOT = highest token id

    # additive causal mask; padded key columns are masked for every real query row
    rows = jax.lax.broadcasted_iota(jnp.int32, (S_pad, S_pad), 0)
    cols = jax.lax.broadcasted_iota(jnp.int32, (S_pad, S_pad), 1)
    causal = jnp.where(cols <= rows, 0.0, -1e30).astype(jnp.float32)

    layer_names = ['ln1_w', 'ln1_b', 'wqkv', 'bqkv', 'wo', 'bo',
                   'ln2_w', 'ln2_b', 'w1', 'b1', 'w2', 'b2']
    layer_ws = [params[n] for n in layer_names]
    tail_ws = [params['final_ln_w'], params['final_ln_b'], params['text_projection']]

    in_specs = [
        pl.BlockSpec((Bt, S_pad, D), lambda b, l, e: (b, 0, 0)),   # token+pos embeddings
        pl.BlockSpec((S_pad, S_pad), lambda b, l, e: (0, 0)),      # causal mask (fetched once)
    ]
    in_specs += [pl.BlockSpec((1,) + w.shape[1:], lambda b, l, e: (l, 0, 0))
                 for w in layer_ws]                                # per-layer weights, streamed
    in_specs += [pl.BlockSpec(w.shape, lambda b, l, e: (0, 0)) for w in tail_ws]

    kernel = functools.partial(clip_encoder_kernel, heads=heads, dim_head=dim_head,
                               batch_tile=Bt)

    out = pl.pallas_call(
        kernel,
        out_shape=jax.ShapeDtypeStruct((B, 1, Dp), jnp.float32),
        grid_spec=pltpu.PrefetchScalarGridSpec(
            num_scalar_prefetch=1,
            grid=(B // Bt, depth),
            in_specs=in_specs,
            out_specs=pl.BlockSpec((Bt, 1, Dp), lambda b, l, e: (b, 0, 0)),
            scratch_shapes=[pltpu.VMEM((Bt, S_pad, D), jnp.float32)],   # resident residual stream
        ),
        compiler_params=pltpu.CompilerParams(
            dimension_semantics=("parallel", "arbitrary"),
            vmem_limit_bytes=48 * 1024 * 1024,
        ),
    )(eot, x0, causal, *layer_ws, *tail_ws)
    return out[:, 0, :]


def init_params(key, vocab, max_len, width, depth, heads, dim_head, proj_dim):
    assert heads * dim_head == width
    keys = jax.random.split(key, 8)
    s = 0.02

    def rnd(k, shape, dtype=jnp.float32):
        return (jax.random.normal(k, shape, jnp.float32) * s).astype(dtype)

    return {
        'tok_emb': rnd(keys[0], (vocab, width)),
        'pos_emb': rnd(keys[1], (max_len, width)),
        # per-layer weights stacked along a leading depth axis (streamed by the depth grid axis);
        # projection matrices stored bf16 (halved HBM traffic, bf16 MXU), LN/biases fp32.
        'ln1_w': jnp.ones((depth, 1, width), jnp.float32),
        'ln1_b': jnp.zeros((depth, 1, width), jnp.float32),
        'wqkv': rnd(keys[2], (depth, width, 3 * width), jnp.bfloat16),
        'bqkv': jnp.zeros((depth, 1, 3 * width), jnp.float32),
        'wo': rnd(keys[3], (depth, width, width), jnp.bfloat16),
        'bo': jnp.zeros((depth, 1, width), jnp.float32),
        'ln2_w': jnp.ones((depth, 1, width), jnp.float32),
        'ln2_b': jnp.zeros((depth, 1, width), jnp.float32),
        'w1': rnd(keys[4], (depth, width, 4 * width), jnp.bfloat16),
        'b1': jnp.zeros((depth, 1, 4 * width), jnp.float32),
        'w2': rnd(keys[5], (depth, 4 * width, width), jnp.bfloat16),
        'b2': jnp.zeros((depth, 1, width), jnp.float32),
        'final_ln_w': jnp.ones((1, width), jnp.float32),
        'final_ln_b': jnp.zeros((1, width), jnp.float32),
        'text_projection': rnd(keys[6], (width, proj_dim), jnp.bfloat16),
    }


if __name__ == "__main__":
    # small CLIP-text-style config
    vocab, max_len = 97, 77
    width, depth, heads, dim_head, proj_dim = 128, 2, 2, 64, 128
    B, S = 2, 8

    params = init_params(jax.random.PRNGKey(1), vocab, max_len, width, depth,
                         heads, dim_head, proj_dim)
    tokens = jax.random.randint(jax.random.PRNGKey(0), (B, S), 0, vocab, dtype=jnp.int32)

    fwd = jax.jit(lambda t: clip_text_embedder_forward(t, params, heads=heads, dim_head=dim_head))
    z = fwd(tokens)
    jax.block_until_ready(z)

    assert z.shape == (B, proj_dim)
    assert z.dtype == jnp.float32
    assert bool(jnp.all(jnp.isfinite(z)))
    norms = jnp.sqrt(jnp.sum(z * z, axis=-1))
    assert bool(jnp.all(jnp.abs(norms - 1.0) < 1e-2))   # normalize=True
    print("KERNEL_OK")
</pallas_src>

<mosaic_0001>
module attributes {stable_mosaic.version = 11 : i64} {
  func.func @clip_encoder_kernel(%arg0: i32, %arg1: i32, %arg2: memref<2xi32, #tpu.memory_space<smem>>, %arg3: memref<2x16x128xf32, #tpu.memory_space<vmem>>, %arg4: memref<16x16xf32, #tpu.memory_space<vmem>>, %arg5: memref<1x1x128xf32, #tpu.memory_space<vmem>>, %arg6: memref<1x1x128xf32, #tpu.memory_space<vmem>>, %arg7: memref<1x128x384xbf16, #tpu.memory_space<vmem>>, %arg8: memref<1x1x384xf32, #tpu.memory_space<vmem>>, %arg9: memref<1x128x128xbf16, #tpu.memory_space<vmem>>, %arg10: memref<1x1x128xf32, #tpu.memory_space<vmem>>, %arg11: memref<1x1x128xf32, #tpu.memory_space<vmem>>, %arg12: memref<1x1x128xf32, #tpu.memory_space<vmem>>, %arg13: memref<1x128x512xbf16, #tpu.memory_space<vmem>>, %arg14: memref<1x1x512xf32, #tpu.memory_space<vmem>>, %arg15: memref<1x512x128xbf16, #tpu.memory_space<vmem>>, %arg16: memref<1x1x128xf32, #tpu.memory_space<vmem>>, %arg17: memref<1x128xf32, #tpu.memory_space<vmem>>, %arg18: memref<1x128xf32, #tpu.memory_space<vmem>>, %arg19: memref<128x128xbf16, #tpu.memory_space<vmem>>, %arg20: memref<2x1x128xf32, #tpu.memory_space<vmem>>, %arg21: memref<2x16x128xf32, #tpu.memory_space<vmem>>) attributes {dimension_semantics = [#tpu.dimension_semantics<parallel>, #tpu.dimension_semantics<arbitrary>], iteration_bounds = array<i64: 1, 2>, scalar_prefetch = 1 : i64, scratch_operands = 1 : i64, tpu.core_type = #tpu.core_type<tc>, window_params = [{transform_indices = @transform_0, window_bounds = array<i64: 2, 16, 128>}, {pipeline_mode = #tpu.pipeline_mode<synchronous>, transform_indices = @transform_1, window_bounds = array<i64: 16, 16>}, {transform_indices = @transform_2, window_bounds = array<i64: 1, 1, 128>}, {transform_indices = @transform_3, window_bounds = array<i64: 1, 1, 128>}, {transform_indices = @transform_4, window_bounds = array<i64: 1, 128, 384>}, {transform_indices = @transform_5, window_bounds = array<i64: 1, 1, 384>}, {transform_indices = @transform_6, window_bounds = array<i64: 1, 128, 128>}, {transform_indices = @transform_7, window_bounds = array<i64: 1, 1, 128>}, {transform_indices = @transform_8, window_bounds = array<i64: 1, 1, 128>}, {transform_indices = @transform_9, window_bounds = array<i64: 1, 1, 128>}, {transform_indices = @transform_10, window_bounds = array<i64: 1, 128, 512>}, {transform_indices = @transform_11, window_bounds = array<i64: 1, 1, 512>}, {transform_indices = @transform_12, window_bounds = array<i64: 1, 512, 128>}, {transform_indices = @transform_13, window_bounds = array<i64: 1, 1, 128>}, {pipeline_mode = #tpu.pipeline_mode<synchronous>, transform_indices = @transform_14, window_bounds = array<i64: 1, 128>}, {pipeline_mode = #tpu.pipeline_mode<synchronous>, transform_indices = @transform_15, window_bounds = array<i64: 1, 128>}, {pipeline_mode = #tpu.pipeline_mode<synchronous>, transform_indices = @transform_16, window_bounds = array<i64: 128, 128>}, {transform_indices = @transform_17, window_bounds = array<i64: 2, 1, 128>}]} {
    %c0_i32 = arith.constant 0 : i32
    %0 = arith.cmpi eq, %arg1, %c0_i32 : i32
    %1 = arith.extui %0 : i1 to i32
    %c0_i32_0 = arith.constant 0 : i32
    %2 = arith.cmpi ne, %1, %c0_i32_0 : i32
    scf.if %2 {
      %c0_95 = arith.constant 0 : index
      %c0_96 = arith.constant 0 : index
      %c0_97 = arith.constant 0 : index
      %240 = vector.load %arg3[%c0_95, %c0_96, %c0_97] : memref<2x16x128xf32, #tpu.memory_space<vmem>>, vector<2x16x128xf32>
      %c0_98 = arith.constant 0 : index
      %c0_99 = arith.constant 0 : index
      %c0_100 = arith.constant 0 : index
      %241 = vector.load %arg21[%c0_98, %c0_99, %c0_100] : memref<2x16x128xf32, #tpu.memory_space<vmem>>, vector<2x16x128xf32>
      tpu.vector_store %arg21[%c0_98, %c0_99, %c0_100], %240 {strides = array<i32>} : memref<2x16x128xf32, #tpu.memory_space<vmem>>, vector<2x16x128xf32>,
    } else {
    }
    %c0 = arith.constant 0 : index
    %c0_1 = arith.constant 0 : index
    %c0_2 = arith.constant 0 : index
    %3 = vector.load %arg21[%c0, %c0_1, %c0_2] : memref<2x16x128xf32, #tpu.memory_space<vmem>>, vector<2x16x128xf32>
    %4 = vector.shape_cast %3 : vector<2x16x128xf32> to vector<32x128xf32>
    %c0_3 = arith.constant 0 : index
    %c0_4 = arith.constant 0 : index
    %c0_5 = arith.constant 0 : index
    %5 = vector.load %arg5[%c0_3, %c0_4, %c0_5] : memref<1x1x128xf32, #tpu.memory_space<vmem>>, vector<1x1x128xf32>
    %6 = vector.shape_cast %5 : vector<1x1x128xf32> to vector<1x128xf32>
    %c0_6 = arith.constant 0 : index
    %c0_7 = arith.constant 0 : index
    %c0_8 = arith.constant 0 : index
    %7 = vector.load %arg6[%c0_6, %c0_7, %c0_8] : memref<1x1x128xf32, #tpu.memory_space<vmem>>, vector<1x1x128xf32>
    %8 = vector.shape_cast %7 : vector<1x1x128xf32> to vector<1x128xf32>
    %cst = arith.constant dense<0.000000e+00> : vector<32xf32>
    %9 = vector.multi_reduction <add>, %4, %cst [1] : vector<32x128xf32> to vector<32xf32>
    %10 = vector.shape_cast %9 : vector<32xf32> to vector<32x1xf32>
    %cst_9 = arith.constant 1.280000e+02 : f32
    %11 = vector.broadcast %cst_9 : f32 to vector<32x1xf32>
    %12 = arith.divf %10, %11 : vector<32x1xf32>
    %13 = vector.broadcast %12 : vector<32x1xf32> to vector<32x128xf32>
    %14 = arith.subf %4, %13 : vector<32x128xf32>
    %15 = arith.mulf %14, %14 : vector<32x128xf32>
    %cst_10 = arith.constant dense<0.000000e+00> : vector<32xf32>
    %16 = vector.multi_reduction <add>, %15, %cst_10 [1] : vector<32x128xf32> to vector<32xf32>
    %17 = vector.shape_cast %16 : vector<32xf32> to vector<32x1xf32>
    %cst_11 = arith.constant 1.280000e+02 : f32
    %18 = vector.broadcast %cst_11 : f32 to vector<32x1xf32>
    %19 = arith.divf %17, %18 : vector<32x1xf32>
    %20 = vector.broadcast %12 : vector<32x1xf32> to vector<32x128xf32>
    %21 = arith.subf %4, %20 : vector<32x128xf32>
    %cst_12 = arith.constant 9.99999974E-6 : f32
    %22 = vector.broadcast %cst_12 : f32 to vector<32x1xf32>
    %23 = arith.addf %19, %22 : vector<32x1xf32>
    %24 = math.rsqrt %23 : vector<32x1xf32>
    %25 = vector.broadcast %24 : vector<32x1xf32> to vector<32x128xf32>
    %26 = arith.mulf %21, %25 : vector<32x128xf32>
    %27 = vector.broadcast %6 : vector<1x128xf32> to vector<32x128xf32>
    %28 = arith.mulf %26, %27 : vector<32x128xf32>
    %29 = vector.broadcast %8 : vector<1x128xf32> to vector<32x128xf32>
    %30 = arith.addf %28, %29 : vector<32x128xf32>
    %31 = arith.truncf %30 : vector<32x128xf32> to vector<32x128xbf16>
    %c0_13 = arith.constant 0 : index
    %c0_14 = arith.constant 0 : index
    %c0_15 = arith.constant 0 : index
    %32 = vector.load %arg7[%c0_13, %c0_14, %c0_15] : memref<1x128x384xbf16, #tpu.memory_space<vmem>>, vector<1x128x384xbf16>
    %33 = vector.shape_cast %32 : vector<1x128x384xbf16> to vector<128x384xbf16>
    %cst_16 = arith.constant dense<0.000000e+00> : vector<32x384xf32>
    %34 = tpu.matmul %31, %33, %cst_16 {dimension_numbers = #tpu.dot_dimension_numbers<[1], [0], [0], [1], [0, 0, 1, 1], [], []>} : vector<32x128xbf16>, vector<128x384xbf16>, vector<32x384xf32> -> vector<32x384xf32>
    %c0_17 = arith.constant 0 : index
    %c0_18 = arith.constant 0 : index
    %c0_19 = arith.constant 0 : index
    %35 = vector.load %arg8[%c0_17, %c0_18, %c0_19] : memref<1x1x384xf32, #tpu.memory_space<vmem>>, vector<1x1x384xf32>
    %36 = vector.shape_cast %35 : vector<1x1x384xf32> to vector<1x384xf32>
    %37 = vector.broadcast %36 : vector<1x384xf32> to vector<32x384xf32>
    %38 = arith.addf %34, %37 : vector<32x384xf32>
    %39 = vector.extract_strided_slice %38 {offsets = [0, 0], sizes = [32, 128], strides = [1, 1]} : vector<32x384xf32> to vector<32x128xf32>
    %cst_20 = arith.constant 1.250000e-01 : f32
    %40 = vector.broadcast %cst_20 : f32 to vector<32x128xf32>
    %41 = arith.mulf %39, %40 : vector<32x128xf32>
    %42 = vector.shape_cast %41 : vector<32x128xf32> to vector<2x16x128xf32>
    %43 = vector.extract_strided_slice %38 {offsets = [0, 128], sizes = [32, 128], strides = [1, 1]} : vector<32x384xf32> to vector<32x128xf32>
    %44 = vector.shape_cast %43 : vector<32x128xf32> to vector<2x16x128xf32>
    %45 = vector.extract_strided_slice %38 {offsets = [0, 256], sizes = [32, 128], strides = [1, 1]} : vector<32x384xf32> to vector<32x128xf32>
    %46 = vector.shape_cast %45 : vector<32x128xf32> to vector<2x16x128xf32>
    %c0_21 = arith.constant 0 : index
    %c0_22 = arith.constant 0 : index
    %47 = vector.load %arg4[%c0_21, %c0_22] : memref<16x16xf32, #tpu.memory_space<vmem>>, vector<16x16xf32>
    %c0_23 = arith.constant 0 : index
    %c0_24 = arith.constant 0 : index
    %c0_25 = arith.constant 0 : index
    %48 = vector.load %arg9[%c0_23, %c0_24, %c0_25] : memref<1x128x128xbf16, #tpu.memory_space<vmem>>, vector<1x128x128xbf16>
    %49 = vector.shape_cast %48 : vector<1x128x128xbf16> to vector<128x128xbf16>
    %c0_26 = arith.constant 0 : index
    %c0_27 = arith.constant 0 : index
    %c0_28 = arith.constant 0 : index
    %50 = vector.load %arg10[%c0_26, %c0_27, %c0_28] : memref<1x1x128xf32, #tpu.memory_space<vmem>>, vector<1x1x128xf32>
    %51 = vector.shape_cast %50 : vector<1x1x128xf32> to vector<1x128xf32>
    %cst_29 = arith.constant 0.000000e+00 : f32
    %52 = vector.broadcast %cst_29 : f32 to vector<16x128xf32>
    %53 = vector.extract_strided_slice %42 {offsets = [0, 0, 0], sizes = [1, 16, 64], strides = [1, 1, 1]} : vector<2x16x128xf32> to vector<1x16x64xf32>
    %54 = vector.shape_cast %53 : vector<1x16x64xf32> to vector<16x64xf32>
    %55 = arith.truncf %54 : vector<16x64xf32> to vector<16x64xbf16>
    %56 = vector.extract_strided_slice %44 {offsets = [0, 0, 0], sizes = [1, 16, 64], strides = [1, 1, 1]} : vector<2x16x128xf32> to vector<1x16x64xf32>
    %57 = vector.shape_cast %56 : vector<1x16x64xf32> to vector<16x64xf32>
    %58 = arith.truncf %57 : vector<16x64xf32> to vector<16x64xbf16>
    %59 = vector.extract_strided_slice %46 {offsets = [0, 0, 0], sizes = [1, 16, 64], strides = [1, 1, 1]} : vector<2x16x128xf32> to vector<1x16x64xf32>
    %60 = vector.shape_cast %59 : vector<1x16x64xf32> to vector<16x64xf32>
    %61 = arith.truncf %60 : vector<16x64xf32> to vector<16x64xbf16>
    %cst_30 = arith.constant dense<0.000000e+00> : vector<16x16xf32>
    %62 = tpu.matmul %55, %58, %cst_30 {dimension_numbers = #tpu.dot_dimension_numbers<[1], [1], [0], [0], [0, 0, 1, 0], [], []>} : vector<16x64xbf16>, vector<16x64xbf16>, vector<16x16xf32> -> vector<16x16xf32>
    %63 = arith.addf %62, %47 : vector<16x16xf32>
    %cst_31 = arith.constant dense<0xFF800000> : vector<16xf32>
    %64 = vector.multi_reduction <maximumf>, %63, %cst_31 [1] : vector<16x16xf32> to vector<16xf32>
    %65 = vector.shape_cast %64 : vector<16xf32> to vector<16x1xf32>
    %66 = vector.broadcast %65 : vector<16x1xf32> to vector<16x16xf32>
    %67 = arith.subf %63, %66 : vector<16x16xf32>
    %68 = math.exp %67 : vector<16x16xf32>
    %cst_32 = arith.constant dense<0.000000e+00> : vector<16xf32>
    %69 = vector.multi_reduction <add>, %68, %cst_32 [1] : vector<16x16xf32> to vector<16xf32>
    %70 = vector.shape_cast %69 : vector<16xf32> to vector<16x1xf32>
    %cst_33 = arith.constant 1.000000e+00 : f32
    %71 = vector.broadcast %cst_33 : f32 to vector<16x1xf32>
    %72 = arith.divf %71, %70 : vector<16x1xf32>
    %73 = vector.broadcast %72 : vector<16x1xf32> to vector<16x16xf32>
    %74 = arith.mulf %68, %73 : vector<16x16xf32>
    %75 = arith.truncf %74 : vector<16x16xf32> to vector<16x16xbf16>
    %cst_34 = arith.constant dense<0.000000e+00> : vector<16x64xf32>
    %76 = tpu.matmul %75, %61, %cst_34 {dimension_numbers = #tpu.dot_dimension_numbers<[1], [0], [0], [1], [0, 0, 1, 1], [], []>} : vector<16x16xbf16>, vector<16x64xbf16>, vector<16x64xf32> -> vector<16x64xf32>
    %77 = arith.truncf %76 : vector<16x64xf32> to vector<16x64xbf16>
    %78 = vector.extract_strided_slice %49 {offsets = [0, 0], sizes = [64, 128], strides = [1, 1]} : vector<128x128xbf16> to vector<64x128xbf16>
    %cst_35 = arith.constant dense<0.000000e+00> : vector<16x128xf32>
    %79 = tpu.matmul %77, %78, %cst_35 {dimension_numbers = #tpu.dot_dimension_numbers<[1], [0], [0], [1], [0, 0, 1, 1], [], []>} : vector<16x64xbf16>, vector<64x128xbf16>, vector<16x128xf32> -> vector<16x128xf32>
    %80 = arith.addf %52, %79 : vector<16x128xf32>
    %81 = vector.extract_strided_slice %42 {offsets = [0, 0, 64], sizes = [1, 16, 64], strides = [1, 1, 1]} : vector<2x16x128xf32> to vector<1x16x64xf32>
    %82 = vector.shape_cast %81 : vector<1x16x64xf32> to vector<16x64xf32>
    %83 = arith.truncf %82 : vector<16x64xf32> to vector<16x64xbf16>
    %84 = vector.extract_strided_slice %44 {offsets = [0, 0, 64], sizes = [1, 16, 64], strides = [1, 1, 1]} : vector<2x16x128xf32> to vector<1x16x64xf32>
    %85 = vector.shape_cast %84 : vector<1x16x64xf32> to vector<16x64xf32>
    %86 = arith.truncf %85 : vector<16x64xf32> to vector<16x64xbf16>
    %87 = vector.extract_strided_slice %46 {offsets = [0, 0, 64], sizes = [1, 16, 64], strides = [1, 1, 1]} : vector<2x16x128xf32> to vector<1x16x64xf32>
    %88 = vector.shape_cast %87 : vector<1x16x64xf32> to vector<16x64xf32>
    %89 = arith.truncf %88 : vector<16x64xf32> to vector<16x64xbf16>
    %cst_36 = arith.constant dense<0.000000e+00> : vector<16x16xf32>
    %90 = tpu.matmul %83, %86, %cst_36 {dimension_numbers = #tpu.dot_dimension_numbers<[1], [1], [0], [0], [0, 0, 1, 0], [], []>} : vector<16x64xbf16>, vector<16x64xbf16>, vector<16x16xf32> -> vector<16x16xf32>
    %91 = arith.addf %90, %47 : vector<16x16xf32>
    %cst_37 = arith.constant dense<0xFF800000> : vector<16xf32>
    %92 = vector.multi_reduction <maximumf>, %91, %cst_37 [1] : vector<16x16xf32> to vector<16xf32>
    %93 = vector.shape_cast %92 : vector<16xf32> to vector<16x1xf32>
    %94 = vector.broadcast %93 : vector<16x1xf32> to vector<16x16xf32>
    %95 = arith.subf %91, %94 : vector<16x16xf32>
    %96 = math.exp %95 : vector<16x16xf32>
    %cst_38 = arith.constant dense<0.000000e+00> : vector<16xf32>
    %97 = vector.multi_reduction <add>, %96, %cst_38 [1] : vector<16x16xf32> to vector<16xf32>
    %98 = vector.shape_cast %97 : vector<16xf32> to vector<16x1xf32>
    %cst_39 = arith.constant 1.000000e+00 : f32
    %99 = vector.broadcast %cst_39 : f32 to vector<16x1xf32>
    %100 = arith.divf %99, %98 : vector<16x1xf32>
    %101 = vector.broadcast %100 : vector<16x1xf32> to vector<16x16xf32>
    %102 = arith.mulf %96, %101 : vector<16x16xf32>
    %103 = arith.truncf %102 : vector<16x16xf32> to vector<16x16xbf16>
    %cst_40 = arith.constant dense<0.000000e+00> : vector<16x64xf32>
    %104 = tpu.matmul %103, %89, %cst_40 {dimension_numbers = #tpu.dot_dimension_numbers<[1], [0], [0], [1], [0, 0, 1, 1], [], []>} : vector<16x16xbf16>, vector<16x64xbf16>, vector<16x64xf32> -> vector<16x64xf32>
    %105 = arith.truncf %104 : vector<16x64xf32> to vector<16x64xbf16>
    %106 = vector.extract_strided_slice %49 {offsets = [64, 0], sizes = [64, 128], strides = [1, 1]} : vector<128x128xbf16> to vector<64x128xbf16>
    %cst_41 = arith.constant dense<0.000000e+00> : vector<16x128xf32>
    %107 = tpu.matmul %105, %106, %cst_41 {dimension_numbers = #tpu.dot_dimension_numbers<[1], [0], [0], [1], [0, 0, 1, 1], [], []>} : vector<16x64xbf16>, vector<64x128xbf16>, vector<16x128xf32> -> vector<16x128xf32>
    %108 = arith.addf %80, %107 : vector<16x128xf32>
    %109 = vector.extract_strided_slice %3 {offsets = [0, 0, 0], sizes = [1, 16, 128], strides = [1, 1, 1]} : vector<2x16x128xf32> to vector<1x16x128xf32>
    %110 = vector.shape_cast %109 : vector<1x16x128xf32> to vector<16x128xf32>
    %111 = arith.addf %110, %108 : vector<16x128xf32>
    %112 = vector.broadcast %51 : vector<1x128xf32> to vector<16x128xf32>
    %113 = arith.addf %111, %112 : vector<16x128xf32>
    %c0_42 = arith.constant 0 : index
    %c0_43 = arith.constant 0 : index
    %c0_44 = arith.constant 0 : index
    %114 = vector.load %arg21[%c0_42, %c0_43, %c0_44] : memref<2x16x128xf32, #tpu.memory_space<vmem>>, vector<1x16x128xf32>
    %115 = vector.shape_cast %114 : vector<1x16x128xf32> to vector<16x128xf32>
    %116 = vector.shape_cast %113 : vector<16x128xf32> to vector<1x16x128xf32>
    tpu.vector_store %arg21[%c0_42, %c0_43, %c0_44], %116 {strides = array<i32>} : memref<2x16x128xf32, #tpu.memory_space<vmem>>, vector<1x16x128xf32>,
    %cst_45 = arith.constant 0.000000e+00 : f32
    %117 = vector.broadcast %cst_45 : f32 to vector<16x128xf32>
    %118 = vector.extract_strided_slice %42 {offsets = [1, 0, 0], sizes = [1, 16, 64], strides = [1, 1, 1]} : vector<2x16x128xf32> to vector<1x16x64xf32>
    %119 = vector.shape_cast %118 : vector<1x16x64xf32> to vector<16x64xf32>
    %120 = arith.truncf %119 : vector<16x64xf32> to vector<16x64xbf16>
    %121 = vector.extract_strided_slice %44 {offsets = [1, 0, 0], sizes = [1, 16, 64], strides = [1, 1, 1]} : vector<2x16x128xf32> to vector<1x16x64xf32>
    %122 = vector.shape_cast %121 : vector<1x16x64xf32> to vector<16x64xf32>
    %123 = arith.truncf %122 : vector<16x64xf32> to vector<16x64xbf16>
    %124 = vector.extract_strided_slice %46 {offsets = [1, 0, 0], sizes = [1, 16, 64], strides = [1, 1, 1]} : vector<2x16x128xf32> to vector<1x16x64xf32>
    %125 = vector.shape_cast %124 : vector<1x16x64xf32> to vector<16x64xf32>
    %126 = arith.truncf %125 : vector<16x64xf32> to vector<16x64xbf16>
    %cst_46 = arith.constant dense<0.000000e+00> : vector<16x16xf32>
    %127 = tpu.matmul %120, %123, %cst_46 {dimension_numbers = #tpu.dot_dimension_numbers<[1], [1], [0], [0], [0, 0, 1, 0], [], []>} : vector<16x64xbf16>, vector<16x64xbf16>, vector<16x16xf32> -> vector<16x16xf32>
    %128 = arith.addf %127, %47 : vector<16x16xf32>
    %cst_47 = arith.constant dense<0xFF800000> : vector<16xf32>
    %129 = vector.multi_reduction <maximumf>, %128, %cst_47 [1] : vector<16x16xf32> to vector<16xf32>
    %130 = vector.shape_cast %129 : vector<16xf32> to vector<16x1xf32>
    %131 = vector.broadcast %130 : vector<16x1xf32> to vector<16x16xf32>
    %132 = arith.subf %128, %131 : vector<16x16xf32>
    %133 = math.exp %132 : vector<16x16xf32>
    %cst_48 = arith.constant dense<0.000000e+00> : vector<16xf32>
    %134 = vector.multi_reduction <add>, %133, %cst_48 [1] : vector<16x16xf32> to vector<16xf32>
    %135 = vector.shape_cast %134 : vector<16xf32> to vector<16x1xf32>
    %cst_49 = arith.constant 1.000000e+00 : f32
    %136 = vector.broadcast %cst_49 : f32 to vector<16x1xf32>
    %137 = arith.divf %136, %135 : vector<16x1xf32>
    %138 = vector.broadcast %137 : vector<16x1xf32> to vector<16x16xf32>
    %139 = arith.mulf %133, %138 : vector<16x16xf32>
    %140 = arith.truncf %139 : vector<16x16xf32> to vector<16x16xbf16>
    %cst_50 = arith.constant dense<0.000000e+00> : vector<16x64xf32>
    %141 = tpu.matmul %140, %126, %cst_50 {dimension_numbers = #tpu.dot_dimension_numbers<[1], [0], [0], [1], [0, 0, 1, 1], [], []>} : vector<16x16xbf16>, vector<16x64xbf16>, vector<16x64xf32> -> vector<16x64xf32>
    %142 = arith.truncf %141 : vector<16x64xf32> to vector<16x64xbf16>
    %143 = vector.extract_strided_slice %49 {offsets = [0, 0], sizes = [64, 128], strides = [1, 1]} : vector<128x128xbf16> to vector<64x128xbf16>
    %cst_51 = arith.constant dense<0.000000e+00> : vector<16x128xf32>
    %144 = tpu.matmul %142, %143, %cst_51 {dimension_numbers = #tpu.dot_dimension_numbers<[1], [0], [0], [1], [0, 0, 1, 1], [], []>} : vector<16x64xbf16>, vector<64x128xbf16>, vector<16x128xf32> -> vector<16x128xf32>
    %145 = arith.addf %117, %144 : vector<16x128xf32>
    %146 = vector.extract_strided_slice %42 {offsets = [1, 0, 64], sizes = [1, 16, 64], strides = [1, 1, 1]} : vector<2x16x128xf32> to vector<1x16x64xf32>
    %147 = vector.shape_cast %146 : vector<1x16x64xf32> to vector<16x64xf32>
    %148 = arith.truncf %147 : vector<16x64xf32> to vector<16x64xbf16>
    %149 = vector.extract_strided_slice %44 {offsets = [1, 0, 64], sizes = [1, 16, 64], strides = [1, 1, 1]} : vector<2x16x128xf32> to vector<1x16x64xf32>
    %150 = vector.shape_cast %149 : vector<1x16x64xf32> to vector<16x64xf32>
    %151 = arith.truncf %150 : vector<16x64xf32> to vector<16x64xbf16>
    %152 = vector.extract_strided_slice %46 {offsets = [1, 0, 64], sizes = [1, 16, 64], strides = [1, 1, 1]} : vector<2x16x128xf32> to vector<1x16x64xf32>
    %153 = vector.shape_cast %152 : vector<1x16x64xf32> to vector<16x64xf32>
    %154 = arith.truncf %153 : vector<16x64xf32> to vector<16x64xbf16>
    %cst_52 = arith.constant dense<0.000000e+00> : vector<16x16xf32>
    %155 = tpu.matmul %148, %151, %cst_52 {dimension_numbers = #tpu.dot_dimension_numbers<[1], [1], [0], [0], [0, 0, 1, 0], [], []>} : vector<16x64xbf16>, vector<16x64xbf16>, vector<16x16xf32> -> vector<16x16xf32>
    %156 = arith.addf %155, %47 : vector<16x16xf32>
    %cst_53 = arith.constant dense<0xFF800000> : vector<16xf32>
    %157 = vector.multi_reduction <maximumf>, %156, %cst_53 [1] : vector<16x16xf32> to vector<16xf32>
    %158 = vector.shape_cast %157 : vector<16xf32> to vector<16x1xf32>
    %159 = vector.broadcast %158 : vector<16x1xf32> to vector<16x16xf32>
    %160 = arith.subf %156, %159 : vector<16x16xf32>
    %161 = math.exp %160 : vector<16x16xf32>
    %cst_54 = arith.constant dense<0.000000e+00> : vector<16xf32>
    %162 = vector.multi_reduction <add>, %161, %cst_54 [1] : vector<16x16xf32> to vector<16xf32>
    %163 = vector.shape_cast %162 : vector<16xf32> to vector<16x1xf32>
    %cst_55 = arith.constant 1.000000e+00 : f32
    %164 = vector.broadcast %cst_55 : f32 to vector<16x1xf32>
    %165 = arith.divf %164, %163 : vector<16x1xf32>
    %166 = vector.broadcast %165 : vector<16x1xf32> to vector<16x16xf32>
    %167 = arith.mulf %161, %166 : vector<16x16xf32>
    %168 = arith.truncf %167 : vector<16x16xf32> to vector<16x16xbf16>
    %cst_56 = arith.constant dense<0.000000e+00> : vector<16x64xf32>
    %169 = tpu.matmul %168, %154, %cst_56 {dimension_numbers = #tpu.dot_dimension_numbers<[1], [0], [0], [1], [0, 0, 1, 1], [], []>} : vector<16x16xbf16>, vector<16x64xbf16>, vector<16x64xf32> -> vector<16x64xf32>
    %170 = arith.truncf %169 : vector<16x64xf32> to vector<16x64xbf16>
    %171 = vector.extract_strided_slice %49 {offsets = [64, 0], sizes = [64, 128], strides = [1, 1]} : vector<128x128xbf16> to vector<64x128xbf16>
    %cst_57 = arith.constant dense<0.000000e+00> : vector<16x128xf32>
    %172 = tpu.matmul %170, %171, %cst_57 {dimension_numbers = #tpu.dot_dimension_numbers<[1], [0], [0], [1], [0, 0, 1, 1], [], []>} : vector<16x64xbf16>, vector<64x128xbf16>, vector<16x128xf32> -> vector<16x128xf32>
    %173 = arith.addf %145, %172 : vector<16x128xf32>
    %174 = vector.extract_strided_slice %3 {offsets = [1, 0, 0], sizes = [1, 16, 128], strides = [1, 1, 1]} : vector<2x16x128xf32> to vector<1x16x128xf32>
    %175 = vector.shape_cast %174 : vector<1x16x128xf32> to vector<16x128xf32>
    %176 = arith.addf %175, %173 : vector<16x128xf32>
    %177 = vector.broadcast %51 : vector<1x128xf32> to vector<16x128xf32>
    %178 = arith.addf %176, %177 : vector<16x128xf32>
    %c1 = arith.constant 1 : index
    %c0_58 = arith.constant 0 : index
    %c0_59 = arith.constant 0 : index
    %179 = vector.load %arg21[%c1, %c0_58, %c0_59] : memref<2x16x128xf32, #tpu.memory_space<vmem>>, vector<1x16x128xf32>
    %180 = vector.shape_cast %179 : vector<1x16x128xf32> to vector<16x128xf32>
    %181 = vector.shape_cast %178 : vector<16x128xf32> to vector<1x16x128xf32>
    tpu.vector_store %arg21[%c1, %c0_58, %c0_59], %181 {strides = array<i32>} : memref<2x16x128xf32, #tpu.memory_space<vmem>>, vector<1x16x128xf32>,
    %c0_60 = arith.constant 0 : index
    %c0_61 = arith.constant 0 : index
    %c0_62 = arith.constant 0 : index
    %182 = vector.load %arg21[%c0_60, %c0_61, %c0_62] : memref<2x16x128xf32, #tpu.memory_space<vmem>>, vector<2x16x128xf32>
    %183 = vector.shape_cast %182 : vector<2x16x128xf32> to vector<32x128xf32>
    %c0_63 = arith.constant 0 : index
    %c0_64 = arith.constant 0 : index
    %c0_65 = arith.constant 0 : index
    %184 = vector.load %arg11[%c0_63, %c0_64, %c0_65] : memref<1x1x128xf32, #tpu.memory_space<vmem>>, vector<1x1x128xf32>
    %185 = vector.shape_cast %184 : vector<1x1x128xf32> to vector<1x128xf32>
    %c0_66 = arith.constant 0 : index
    %c0_67 = arith.constant 0 : index
    %c0_68 = arith.constant 0 : index
    %186 = vector.load %arg12[%c0_66, %c0_67, %c0_68] : memref<1x1x128xf32, #tpu.memory_space<vmem>>, vector<1x1x128xf32>
    %187 = vector.shape_cast %186 : vector<1x1x128xf32> to vector<1x128xf32>
    %cst_69 = arith.constant dense<0.000000e+00> : vector<32xf32>
    %188 = vector.multi_reduction <add>, %183, %cst_69 [1] : vector<32x128xf32> to vector<32xf32>
    %189 = vector.shape_cast %188 : vector<32xf32> to vector<32x1xf32>
    %cst_70 = arith.constant 1.280000e+02 : f32
    %190 = vector.broadcast %cst_70 : f32 to vector<32x1xf32>
    %191 = arith.divf %189, %190 : vector<32x1xf32>
    %192 = vector.broadcast %191 : vector<32x1xf32> to vector<32x128xf32>
    %193 = arith.subf %183, %192 : vector<32x128xf32>
    %194 = arith.mulf %193, %193 : vector<32x128xf32>
    %cst_71 = arith.constant dense<0.000000e+00> : vector<32xf32>
    %195 = vector.multi_reduction <add>, %194, %cst_71 [1] : vector<32x128xf32> to vector<32xf32>
    %196 = vector.shape_cast %195 : vector<32xf32> to vector<32x1xf32>
    %cst_72 = arith.constant 1.280000e+02 : f32
    %197 = vector.broadcast %cst_72 : f32 to vector<32x1xf32>
    %198 = arith.divf %196, %197 : vector<32x1xf32>
    %199 = vector.broadcast %191 : vector<32x1xf32> to vector<32x128xf32>
    %200 = arith.subf %183, %199 : vector<32x128xf32>
    %cst_73 = arith.constant 9.99999974E-6 : f32
    %201 = vector.broadcast %cst_73 : f32 to vector<32x1xf32>
    %202 = arith.addf %198, %201 : vector<32x1xf32>
    %203 = math.rsqrt %202 : vector<32x1xf32>
    %204 = vector.broadcast %203 : vector<32x1xf32> to vector<32x128xf32>
    %205 = arith.mulf %200, %204 : vector<32x128xf32>
    %206 = vector.broadcast %185 : vector<1x128xf32> to vector<32x128xf32>
    %207 = arith.mulf %205, %206 : vector<32x128xf32>
    %208 = vector.broadcast %187 : vector<1x128xf32> to vector<32x128xf32>
    %209 = arith.addf %207, %208 : vector<32x128xf32>
    %210 = arith.truncf %209 : vector<32x128xf32> to vector<32x128xbf16>
    %c0_74 = arith.constant 0 : index
    %c0_75 = arith.constant 0 : index
    %c0_76 = arith.constant 0 : index
    %211 = vector.load %arg13[%c0_74, %c0_75, %c0_76] : memref<1x128x512xbf16, #tpu.memory_space<vmem>>, vector<1x128x512xbf16>
    %212 = vector.shape_cast %211 : vector<1x128x512xbf16> to vector<128x512xbf16>
    %cst_77 = arith.constant dense<0.000000e+00> : vector<32x512xf32>
    %213 = tpu.matmul %210, %212, %cst_77 {dimension_numbers = #tpu.dot_dimension_numbers<[1], [0], [0], [1], [0, 0, 1, 1], [], []>} : vector<32x128xbf16>, vector<128x512xbf16>, vector<32x512xf32> -> vector<32x512xf32>
    %c0_78 = arith.constant 0 : index
    %c0_79 = arith.constant 0 : index
    %c0_80 = arith.constant 0 : index
    %214 = vector.load %arg14[%c0_78, %c0_79, %c0_80] : memref<1x1x512xf32, #tpu.memory_space<vmem>>, vector<1x1x512xf32>
    %215 = vector.shape_cast %214 : vector<1x1x512xf32> to vector<1x512xf32>
    %216 = vector.broadcast %215 : vector<1x512xf32> to vector<32x512xf32>
    %217 = arith.addf %213, %216 : vector<32x512xf32>
    %cst_81 = arith.constant 8.510000e-01 : f32
    %218 = vector.broadcast %cst_81 : f32 to vector<32x512xf32>
    %219 = arith.mulf %218, %217 : vector<32x512xf32>
    %220 = math.tanh %219 : vector<32x512xf32>
    %cst_82 = arith.constant 1.000000e+00 : f32
    %221 = vector.broadcast %cst_82 : f32 to vector<32x512xf32>
    %222 = arith.addf %220, %221 : vector<32x512xf32>
    %cst_83 = arith.constant 5.000000e-01 : f32
    %223 = vector.broadcast %cst_83 : f32 to vector<32x512xf32>
    %224 = arith.mulf %223, %222 : vector<32x512xf32>
    %225 = arith.mulf %217, %224 : vector<32x512xf32>
    %226 = arith.truncf %225 : vector<32x512xf32> to vector<32x512xbf16>
    %c0_84 = arith.constant 0 : index
    %c0_85 = arith.constant 0 : index
    %c0_86 = arith.constant 0 : index
    %227 = vector.load %arg15[%c0_84, %c0_85, %c0_86] : memref<1x512x128xbf16, #tpu.memory_space<vmem>>, vector<1x512x128xbf16>
    %228 = vector.shape_cast %227 : vector<1x512x128xbf16> to vector<512x128xbf16>
    %cst_87 = arith.constant dense<0.000000e+00> : vector<32x128xf32>
    %229 = tpu.matmul %226, %228, %cst_87 {dimension_numbers = #tpu.dot_dimension_numbers<[1], [0], [0], [1], [0, 0, 1, 1], [], []>} : vector<32x512xbf16>, vector<512x128xbf16>, vector<32x128xf32> -> vector<32x128xf32>
    %c0_88 = arith.constant 0 : index
    %c0_89 = arith.constant 0 : index
    %c0_90 = arith.constant 0 : index
    %230 = vector.load %arg16[%c0_88, %c0_89, %c0_90] : memref<1x1x128xf32, #tpu.memory_space<vmem>>, vector<1x1x128xf32>
    %231 = vector.shape_cast %230 : vector<1x1x128xf32> to vector<1x128xf32>
    %232 = vector.broadcast %231 : vector<1x128xf32> to vector<32x128xf32>
    %233 = arith.addf %229, %232 : vector<32x128xf32>
    %234 = arith.addf %183, %233 : vector<32x128xf32>
    %235 = vector.shape_cast %234 : vector<32x128xf32> to vector<2x16x128xf32>
    %c0_91 = arith.constant 0 : index
    %c0_92 = arith.constant 0 : index
    %c0_93 = arith.constant 0 : index
    %236 = vector.load %arg21[%c0_91, %c0_92, %c0_93] : memref<2x16x128xf32, #tpu.memory_space<vmem>>, vector<2x16x128xf32>
    tpu.vector_store %arg21[%c0_91, %c0_92, %c0_93], %235 {strides = array<i32>} : memref<2x16x128xf32, #tpu.memory_space<vmem>>, vector<2x16x128xf32>,
    %c1_i32 = arith.constant 1 : i32
    %237 = arith.cmpi eq, %arg1, %c1_i32 : i32
    %238 = arith.extui %237 : i1 to i32
    %c0_i32_94 = arith.constant 0 : i32
    %239 = arith.cmpi ne, %238, %c0_i32_94 : i32
    scf.if %239 {
      %c2_i32 = arith.constant 2 : i32
      %240 = arith.muli %arg0, %c2_i32 : i32
      %c0_i32_95 = arith.constant 0 : i32
      %241 = arith.addi %240, %c0_i32_95 : i32
      %242 = arith.index_cast %241 : i32 to index
      %243 = memref.load %arg2[%242] : memref<2xi32, #tpu.memory_space<smem>>
      %c0_96 = arith.constant 0 : index
      %244 = arith.index_cast %243 : i32 to index
      %c0_97 = arith.constant 0 : index
      %245 = vector.load %arg21[%c0_96, %244, %c0_97] : memref<2x16x128xf32, #tpu.memory_space<vmem>>, vector<1x1x128xf32>
      %246 = vector.shape_cast %245 : vector<1x1x128xf32> to vector<1x128xf32>
      %c2_i32_98 = arith.constant 2 : i32
      %247 = arith.muli %arg0, %c2_i32_98 : i32
      %c1_i32_99 = arith.constant 1 : i32
      %248 = arith.addi %247, %c1_i32_99 : i32
      %249 = arith.index_cast %248 : i32 to index
      %250 = memref.load %arg2[%249] : memref<2xi32, #tpu.memory_space<smem>>
      %c1_100 = arith.constant 1 : index
      %251 = arith.index_cast %250 : i32 to index
      %c0_101 = arith.constant 0 : index
      %252 = vector.load %arg21[%c1_100, %251, %c0_101] : memref<2x16x128xf32, #tpu.memory_space<vmem>>, vector<1x1x128xf32>
      %253 = vector.shape_cast %252 : vector<1x1x128xf32> to vector<1x128xf32>
      %254 = tpu.concatenate %246, %253 in 0 : vector<1x128xf32>, vector<1x128xf32> -> vector<2x128xf32>
      %c0_102 = arith.constant 0 : index
      %c0_103 = arith.constant 0 : index
      %255 = vector.load %arg17[%c0_102, %c0_103] : memref<1x128xf32, #tpu.memory_space<vmem>>, vector<1x128xf32>
      %c0_104 = arith.constant 0 : index
      %c0_105 = arith.constant 0 : index
      %256 = vector.load %arg18[%c0_104, %c0_105] : memref<1x128xf32, #tpu.memory_space<vmem>>, vector<1x128xf32>
      %cst_106 = arith.constant dense<0.000000e+00> : vector<2xf32>
      %257 = vector.multi_reduction <add>, %254, %cst_106 [1] : vector<2x128xf32> to vector<2xf32>
      %258 = vector.shape_cast %257 : vector<2xf32> to vector<2x1xf32>
      %cst_107 = arith.constant 1.280000e+02 : f32
      %259 = vector.broadcast %cst_107 : f32 to vector<2x1xf32>
      %260 = arith.divf %258, %259 : vector<2x1xf32>
      %261 = vector.broadcast %260 : vector<2x1xf32> to vector<2x128xf32>
      %262 = arith.subf %254, %261 : vector<2x128xf32>
      %263 = arith.mulf %262, %262 : vector<2x128xf32>
      %cst_108 = arith.constant dense<0.000000e+00> : vector<2xf32>
      %264 = vector.multi_reduction <add>, %263, %cst_108 [1] : vector<2x128xf32> to vector<2xf32>
      %265 = vector.shape_cast %264 : vector<2xf32> to vector<2x1xf32>
      %cst_109 = arith.constant 1.280000e+02 : f32
      %266 = vector.broadcast %cst_109 : f32 to vector<2x1xf32>
      %267 = arith.divf %265, %266 : vector<2x1xf32>
      %268 = vector.broadcast %260 : vector<2x1xf32> to vector<2x128xf32>
      %269 = arith.subf %254, %268 : vector<2x128xf32>
      %cst_110 = arith.constant 9.99999974E-6 : f32
      %270 = vector.broadcast %cst_110 : f32 to vector<2x1xf32>
      %271 = arith.addf %267, %270 : vector<2x1xf32>
      %272 = math.rsqrt %271 : vector<2x1xf32>
      %273 = vector.broadcast %272 : vector<2x1xf32> to vector<2x128xf32>
      %274 = arith.mulf %269, %273 : vector<2x128xf32>
      %275 = vector.broadcast %255 : vector<1x128xf32> to vector<2x128xf32>
      %276 = arith.mulf %274, %275 : vector<2x128xf32>
      %277 = vector.broadcast %256 : vector<1x128xf32> to vector<2x128xf32>
      %278 = arith.addf %276, %277 : vector<2x128xf32>
      %279 = arith.truncf %278 : vector<2x128xf32> to vector<2x128xbf16>
      %c0_111 = arith.constant 0 : index
      %c0_112 = arith.constant 0 : index
      %280 = vector.load %arg19[%c0_111, %c0_112] : memref<128x128xbf16, #tpu.memory_space<vmem>>, vector<128x128xbf16>
      %cst_113 = arith.constant dense<0.000000e+00> : vector<2x128xf32>
      %281 = tpu.matmul %279, %280, %cst_113 {dimension_numbers = #tpu.dot_dimension_numbers<[1], [0], [0], [1], [0, 0, 1, 1], [], []>} : vector<2x128xbf16>, vector<128x128xbf16>, vector<2x128xf32> -> vector<2x128xf32>
      %282 = arith.mulf %281, %281 : vector<2x128xf32>
      %cst_114 = arith.constant dense<0.000000e+00> : vector<2xf32>
      %283 = vector.multi_reduction <add>, %282, %cst_114 [1] : vector<2x128xf32> to vector<2xf32>
      %284 = vector.shape_cast %283 : vector<2xf32> to vector<2x1xf32>
      %285 = math.rsqrt %284 : vector<2x1xf32>
      %286 = vector.broadcast %285 : vector<2x1xf32> to vector<2x128xf32>
      %287 = arith.mulf %281, %286 : vector<2x128xf32>
      %288 = vector.shape_cast %287 : vector<2x128xf32> to vector<2x1x128xf32>
      %c0_115 = arith.constant 0 : index
      %c0_116 = arith.constant 0 : index
      %c0_117 = arith.constant 0 : index
      %289 = vector.load %arg20[%c0_115, %c0_116, %c0_117] : memref<2x1x128xf32, #tpu.memory_space<vmem>>, vector<2x1x128xf32>
      tpu.vector_store %arg20[%c0_115, %c0_116, %c0_117], %288 {strides = array<i32>} : memref<2x1x128xf32, #tpu.memory_space<vmem>>, vector<2x1x128xf32>,
    } else {
    }
    return
  }
  func.func @transform_0(%arg0: i32, %arg1: i32, %arg2: memref<2xi32, #tpu.memory_space<smem>>) -> (i32, i32, i32) {
    %c0_i32 = arith.constant 0 : i32
    %c0_i32_0 = arith.constant 0 : i32
    %c0_i32_1 = arith.constant 0 : i32
    return %arg0, %c0_i32, %c0_i32_0 : i32, i32, i32
  }
  func.func @transform_1(%arg0: i32, %arg1: i32, %arg2: memref<2xi32, #tpu.memory_space<smem>>) -> (i32, i32) {
    %c0_i32 = arith.constant 0 : i32
    %c0_i32_0 = arith.constant 0 : i32
    %c0_i32_1 = arith.constant 0 : i32
    return %c0_i32, %c0_i32_0 : i32, i32
  }
  func.func @transform_2(%arg0: i32, %arg1: i32, %arg2: memref<2xi32, #tpu.memory_space<smem>>) -> (i32, i32, i32) {
    %c0_i32 = arith.constant 0 : i32
    %c0_i32_0 = arith.constant 0 : i32
    %c0_i32_1 = arith.constant 0 : i32
    return %arg1, %c0_i32, %c0_i32_0 : i32, i32, i32
  }
  func.func @transform_3(%arg0: i32, %arg1: i32, %arg2: memref<2xi32, #tpu.memory_space<smem>>) -> (i32, i32, i32) {
    %c0_i32 = arith.constant 0 : i32
    %c0_i32_0 = arith.constant 0 : i32
    %c0_i32_1 = arith.constant 0 : i32
    return %arg1, %c0_i32, %c0_i32_0 : i32, i32, i32
  }
  func.func @transform_4(%arg0: i32, %arg1: i32, %arg2: memref<2xi32, #tpu.memory_space<smem>>) -> (i32, i32, i32) {
    %c0_i32 = arith.constant 0 : i32
    %c0_i32_0 = arith.constant 0 : i32
    %c0_i32_1 = arith.constant 0 : i32
    return %arg1, %c0_i32, %c0_i32_0 : i32, i32, i32
  }
  func.func @transform_5(%arg0: i32, %arg1: i32, %arg2: memref<2xi32, #tpu.memory_space<smem>>) -> (i32, i32, i32) {
    %c0_i32 = arith.constant 0 : i32
    %c0_i32_0 = arith.constant 0 : i32
    %c0_i32_1 = arith.constant 0 : i32
    return %arg1, %c0_i32, %c0_i32_0 : i32, i32, i32
  }
  func.func @transform_6(%arg0: i32, %arg1: i32, %arg2: memref<2xi32, #tpu.memory_space<smem>>) -> (i32, i32, i32) {
    %c0_i32 = arith.constant 0 : i32
    %c0_i32_0 = arith.constant 0 : i32
    %c0_i32_1 = arith.constant 0 : i32
    return %arg1, %c0_i32, %c0_i32_0 : i32, i32, i32
  }
  func.func @transform_7(%arg0: i32, %arg1: i32, %arg2: memref<2xi32, #tpu.memory_space<smem>>) -> (i32, i32, i32) {
    %c0_i32 = arith.constant 0 : i32
    %c0_i32_0 = arith.constant 0 : i32
    %c0_i32_1 = arith.constant 0 : i32
    return %arg1, %c0_i32, %c0_i32_0 : i32, i32, i32
  }
  func.func @transform_8(%arg0: i32, %arg1: i32, %arg2: memref<2xi32, #tpu.memory_space<smem>>) -> (i32, i32, i32) {
    %c0_i32 = arith.constant 0 : i32
    %c0_i32_0 = arith.constant 0 : i32
    %c0_i32_1 = arith.constant 0 : i32
    return %arg1, %c0_i32, %c0_i32_0 : i32, i32, i32
  }
  func.func @transform_9(%arg0: i32, %arg1: i32, %arg2: memref<2xi32, #tpu.memory_space<smem>>) -> (i32, i32, i32) {
    %c0_i32 = arith.constant 0 : i32
    %c0_i32_0 = arith.constant 0 : i32
    %c0_i32_1 = arith.constant 0 : i32
    return %arg1, %c0_i32, %c0_i32_0 : i32, i32, i32
  }
  func.func @transform_10(%arg0: i32, %arg1: i32, %arg2: memref<2xi32, #tpu.memory_space<smem>>) -> (i32, i32, i32) {
    %c0_i32 = arith.constant 0 : i32
    %c0_i32_0 = arith.constant 0 : i32
    %c0_i32_1 = arith.constant 0 : i32
    return %arg1, %c0_i32, %c0_i32_0 : i32, i32, i32
  }
  func.func @transform_11(%arg0: i32, %arg1: i32, %arg2: memref<2xi32, #tpu.memory_space<smem>>) -> (i32, i32, i32) {
    %c0_i32 = arith.constant 0 : i32
    %c0_i32_0 = arith.constant 0 : i32
    %c0_i32_1 = arith.constant 0 : i32
    return %arg1, %c0_i32, %c0_i32_0 : i32, i32, i32
  }
  func.func @transform_12(%arg0: i32, %arg1: i32, %arg2: memref<2xi32, #tpu.memory_space<smem>>) -> (i32, i32, i32) {
    %c0_i32 = arith.constant 0 : i32
    %c0_i32_0 = arith.constant 0 : i32
    %c0_i32_1 = arith.constant 0 : i32
    return %arg1, %c0_i32, %c0_i32_0 : i32, i32, i32
  }
  func.func @transform_13(%arg0: i32, %arg1: i32, %arg2: memref<2xi32, #tpu.memory_space<smem>>) -> (i32, i32, i32) {
    %c0_i32 = arith.constant 0 : i32
    %c0_i32_0 = arith.constant 0 : i32
    %c0_i32_1 = arith.constant 0 : i32
    return %arg1, %c0_i32, %c0_i32_0 : i32, i32, i32
  }
  func.func @transform_14(%arg0: i32, %arg1: i32, %arg2: memref<2xi32, #tpu.memory_space<smem>>) -> (i32, i32) {
    %c0_i32 = arith.constant 0 : i32
    %c0_i32_0 = arith.constant 0 : i32
    %c0_i32_1 = arith.constant 0 : i32
    return %c0_i32, %c0_i32_0 : i32, i32
  }
  func.func @transform_15(%arg0: i32, %arg1: i32, %arg2: memref<2xi32, #tpu.memory_space<smem>>) -> (i32, i32) {
    %c0_i32 = arith.constant 0 : i32
    %c0_i32_0 = arith.constant 0 : i32
    %c0_i32_1 = arith.constant 0 : i32
    return %c0_i32, %c0_i32_0 : i32, i32
  }
  func.func @transform_16(%arg0: i32, %arg1: i32, %arg2: memref<2xi32, #tpu.memory_space<smem>>) -> (i32, i32) {
    %c0_i32 = arith.constant 0 : i32
    %c0_i32_0 = arith.constant 0 : i32
    %c0_i32_1 = arith.constant 0 : i32
    return %c0_i32, %c0_i32_0 : i32, i32
  }
  func.func @transform_17(%arg0: i32, %arg1: i32, %arg2: memref<2xi32, #tpu.memory_space<smem>>) -> (i32, i32, i32) {
    %c0_i32 = arith.constant 0 : i32
    %c0_i32_0 = arith.constant 0 : i32
    %c0_i32_1 = arith.constant 0 : i32
    return %arg0, %c0_i32, %c0_i32_0 : i32, i32, i32
  }
}

</mosaic_0001>

<bundles_post_ra>
// kernel: _lambda_.1
= control target key start
LH: loop header
LB: loop body
LE: loop exit
PB: predicated region body
PF: predicated region fallthrough
CT: control target
= control target key end

     0   :  { %s4878_s0 = inlined_call_operand.vmem [shape: s32[2], index: 0, kind: input, shape index: {}]   ;;  %s4879_s1 = inlined_call_operand.vmem [shape: f32[2,16,128], index: 1, kind: input, shape index: {}]   ;;  %s4880_s2 = inlined_call_operand.vmem [shape: f32[16,16], index: 2, kind: input, shape index: {}]   ;;  %s4881_s3 = inlined_call_operand.vmem [shape: f32[2,1,128], index: 3, kind: input, shape index: {}, may-alias: {3,9}]   ;;  %s4882_s4 = inlined_call_operand.vmem [shape: f32[2,1,128], index: 4, kind: input, shape index: {}, may-alias: {4,8,10,14}]   ;;  %s4883_s5 = inlined_call_operand.hbm [shape: bf16[2,128,384], index: 5, kind: input, shape index: {}]   ;;  %s4884_s6 = inlined_call_operand.vmem [shape: f32[2,1,384], index: 6, kind: input, shape index: {}]   ;;  %s4885_s7 = inlined_call_operand.vmem [shape: bf16[2,128,128], index: 7, kind: input, shape index: {}]   ;;  %s4886_s8 = inlined_call_operand.vmem [shape: f32[2,1,128], index: 8, kind: input, shape index: {}, may-alias: {4,8,10,14}]   ;;  %s4887_s9 = inlined_call_operand.vmem [shape: f32[2,1,128], index: 9, kind: input, shape index: {}, may-alias: {3,9}]   ;;  %s4888_s10 = inlined_call_operand.vmem [shape: f32[2,1,128], index: 10, kind: input, shape index: {}, may-alias: {4,8,10,14}]   ;;  %s4889_s11 = inlined_call_operand.hbm [shape: bf16[2,128,512], index: 11, kind: input, shape index: {}]   ;;  %s4890_s12 = inlined_call_operand.vmem [shape: f32[2,1,512], index: 12, kind: input, shape index: {}]   ;;  %s4891_s13 = inlined_call_operand.hbm [shape: bf16[2,512,128], index: 13, kind: input, shape index: {}]   ;;  %s4892_s14 = inlined_call_operand.vmem [shape: f32[2,1,128], index: 14, kind: input, shape index: {}, may-alias: {4,8,10,14}]   ;;  %s4893_s15 = inlined_call_operand.vmem [shape: f32[1,128], index: 15, kind: input, shape index: {}]   ;;  %s4894_s16 = inlined_call_operand.vmem [shape: f32[1,128], index: 16, kind: input, shape index: {}]   ;;  %s4895_s17 = inlined_call_operand.vmem [shape: bf16[128,128], index: 17, kind: input, shape index: {}]   ;;  %s4896_s18 = inlined_call_operand.hbm [shape: f32[2,1,128], index: 18, kind: output, shape index: {}]  }
   0x1   :  { %4905 = sst [smem:[#allocation22_spill]] %s4878_s0 }
   0x2   :  { %4906 = sst [smem:[#allocation23_spill]] %s4879_s1 }
   0x3   :  { %4907 = sst [smem:[#allocation24_spill]] %s4880_s2 }
   0x4   :  { %4908 = sst [smem:[#allocation25_spill]] %s4883_s5 }
   0x5   :  { %4909 = sst [smem:[#allocation26_spill]] %s4885_s7 }
   0x6   :  { %4910 = sst [smem:[#allocation27_spill]] %s4887_s9 }
   0x7   :  { %4911 = sst [smem:[#allocation28_spill]] %s4888_s10 }
   0x8   :  { %4912 = sst [smem:[#allocation29_spill]] %s4889_s11 }
   0x9   :  { %4913 = sst [smem:[#allocation30_spill]] %s4890_s12 }
   0xa   :  { %4914 = sst [smem:[#allocation31_spill]] %s4891_s13 }
   0xb   :  { %4915 = sst [smem:[#allocation32_spill]] %s4892_s14 }
   0xc   :  { %4916 = sst [smem:[#allocation33_spill]] %s4893_s15 }
   0xd   :  { %4917 = sst [smem:[#allocation34_spill]] %s4894_s16 }
   0xe   :  { %4918 = sst [smem:[#allocation35_spill]] %s4895_s17 }
   0xf   :  { %4919 = sst [smem:[#allocation36_spill]] %s4896_s18 }
  0x10   :  { %s4920_s29 = sld [smem:[#allocation22_spill]] }
  0x16   :  { %s23_s12 = sshll.u32 %s4920_s29, 4  ;;  %s24_s12 = int_to_ptr.vmem [resolvable:$true] %s23_s12 }
  0x17   :  { %s3914_s30 = scalar_lea.vmem %s24_s12, 16  ;;  %p3919_p1 = scmp.lt.s32.totalorder %s24_s12, %s24_s12 }
  0x18   :  { %p3915_p0 = scmp.ne.s32.totalorder %s24_s12, %s3914_s30  ;;  %p3920_p2 = scmp.lt.s32.totalorder %s3914_s30, %s3914_s30 }
  0x1a   :  { %p3921_p3 = por %p3920_p2, %p3919_p1 }
  0x1c   :  { %p3922_p4 = pnand %p3921_p3, %p3915_p0 }
  0x1e   :  { %3925 = shalt.err (!%p3922_p4)  }
  0x1f   :  { %s4096_s0 = smov [#allocation4]  }
  0x20   :  { %26 = dma.vmem_to_smem %s24_s12, 16, %s4096_s0, [#allocation3] }
  0x21   :  { %4058 = dma.done.wait [#allocation3], 16 }
  0x22   :  { %4059 = vsyncadd [#allocation3], 4294967280 }
  0x23   :  { %28 = sfence }
  0x24   :  { %29 = vsyncpa [#allocation6], 0 }
  0x25   :  { %31 = vsyncpa [#allocation6 + $0x1], 0 }
  0x26   :  { %32 = vsyncpa [#allocation9], 0 }
  0x27   :  { %34 = vsyncpa [#allocation9 + $0x1], 0 }
  0x28   :  { %35 = vsyncpa [#allocation7], 0  ;;  %s4214_s19 = smov 0   ;;  %s4216_s1 = smov 0  }
  0x29   :  { %s4218_s20 = smov 0   ;;  %s4220_s21 = smov 0  }
  0x2a   :  { %s4222_s22 = smov 0   ;;  %s4224_s2 = smov 0  }
  0x2b LB: > { %4921 = sst [smem:[#allocation16_spill]] %s4078_s1  ;;  %s4243_s12 = sadd.s32 4294967295, %s4094_s2   ;;  %s4094_s2 = sphi %s4224_s2, %s41_s2   ;;  %s4090_s22 = sphi %s4222_s22, %s4956_s22   ;;  %s4086_s21 = sphi %s4220_s21, %s4955_s21   ;;  %s4082_s20 = sphi %s4218_s20, %s4954_s20   ;;  %s4078_s1 = sphi %s4216_s1, %s4953_s1   ;;  %s4074_s19 = sphi %s4214_s19, %s4952_s19  }
  0x2c   : > { %4922 = sst [smem:[#allocation17_spill]] %s4082_s20  ;;  %s50_s23 = sadd.s32 1, %s4090_s22 }
  0x2d   : > { %4923 = sst [smem:[#allocation18_spill]] %s4090_s22  ;;  %p51_p5 = scmp.ge.s32.totalorder %s50_s23, 2 }
  0x2e   : > { %4924 = sst [smem:[#allocation19_spill]] %s4094_s2  ;;  %s159_s24 = sadd.s32 1, %s4082_s20 }
  0x2f   : > { %p166_p6 = scmp.ne.s32.totalorder %s4082_s20, %s4078_s1  ;;  %p167_p7 = scmp.eq.s32.totalorder %s4094_s2, 0 }
  0x30   : > { %s4958_s23 = smov (%p51_p5, %s50_s23), 0  ;;  %p172_p9 = scmp.ne.s32.totalorder %s4078_s1, %s4074_s19 }
  0x31   : > { %4925 = sst [smem:[#allocation20_spill]] %s4958_s23  ;;  %p168_p8 = por %p167_p7, %p166_p6 }
  0x32   : > { %s156_s25 = ssub.s32 %s4090_s22, %s4958_s23  ;;  %p173_p10 = scmp.eq.s32.totalorder %s4243_s12, 0 }
  0x33   : > { %p157_p11 = scmp.eq.s32.totalorder %s156_s25, 0  ;;  %p3631_p13 = scmp.lt.s32.totalorder %s4094_s2, 2 }
  0x34   : > { %p4256_p12 = por %p173_p10, %p172_p9  ;;  %s4265_s28 = sand.u32 1, %s4082_s20  }
  0x35   : > { %s4262_s27 = scalar_select %p157_p11, %s4082_s20, %s159_s24  }
  0x36   : > { %p4267_p0 = pnand %p3631_p13, %p168_p8  ;;  %s607_s30 = sand.u32 1, %s4094_s2  }
  0x37   : > { %4927 = sst [smem:[#allocation21_spill]] %s4262_s27  ;;  %s3211_s0 = sshll.u32 %s4265_s28, 8 }
  0x38   : > { %s3357_s19 = sshll.u32 %s4090_s22, 12  ;;  %s4929_s11 = sld [smem:[#allocation29_spill]] }
  0x39   : > { %s611_s16 = scalar_lea.vmem [#allocation8], %s3211_s0  ;;  %s4277_s24 = scalar_lea.sflag [#allocation9], %s607_s30 }
  0x3a   : > { %s618_s15 = sshll.u32 %s611_s16, 4  ;;  %p3928_p1 = pneg %p4267_p0  ;;  %s619_s15 = int_to_ptr.vmem [resolvable:$true] %s618_s15 }
  0x3b   : > { %s3939_s27 = scalar_lea.vmem %s619_s15, 4096  ;;  %s4097_s20 = smov [#allocation8]  }
  0x3c   : > { %p3940_p2 = scmp.ne.s32.totalorder %s619_s15, %s3939_s27  ;;  %s3944_s17 = sshll.u32 %s4097_s20, 4  ;;  %s3945_s17 = int_to_ptr.vmem [resolvable:$false] %s3944_s17 }
  0x3d   : > { %s3946_s14 = scalar_lea.vmem %s3945_s17, 8192  ;;  %p3947_p5 = scmp.lt.s32.totalorder %s619_s15, %s3945_s17 }
  0x3e   : > { %s617_s18 = scalar_lea.hbm %s4929_s11, %s3357_s19  ;;  %p3942_p3 = pnand %p3940_p2, %p3928_p1 }
  0x3f   : > { %p3948_p6 = scmp.lt.s32.totalorder %s3946_s14, %s3939_s27 }
  0x40   : > { %p3943_p4 = pneg %p3942_p3 }
  0x41   : > { %p3949_p7 = por %p3948_p6, %p3947_p5 }
  0x43   : > { %p3950_p8 = pnand %p3949_p7, %p3943_p4 }
  0x45   : > { %3953 = shalt.err (!%p3950_p8)
}
  0x46   : > { %s4098_s16 = smov 256   ;;  %s4099_s23 = smov 16  }
  0x47   : > { %3627 = dma.hbm_to_vmem [thread:$0]  (!%p4267_p0), %s617_s18, 4096, %s619_s15, %s4277_s24, %s4098_s16, %s4098_s16, %s4099_s23  }
  0x48   : > { %s4930_s13 = sld [smem:[#allocation31_spill]]  ;;  %s639_s14 = scalar_lea.vmem [#allocation10], %s3211_s0 }
  0x49   : > { %s646_s17 = sshll.u32 %s639_s14, 4  ;;  %p3217_p9 = scmp.ge.s32.totalorder %s4094_s2, 1  ;;  %s4292_s17 = int_to_ptr.vmem [resolvable:$true] %s646_s17 }
  0x4a   : > { %p660_p10 = scmp.lt.s32.totalorder %s4094_s2, 3  ;;  %s3607_s11 = smul.u32 192, %s4265_s28 }
  0x4b   : > { %s3608_s10 = smul.u32 3072, %s4090_s22  ;;  %s4932_s5 = sld [smem:[#allocation25_spill]] }
  0x4c   : > { %p4296_p11 = pnand %p3217_p9, %p660_p10  ;;  %s557_s16 = scalar_lea.vmem [#allocation5], %s3607_s11 }
  0x4d   : > { %s554_s23 = scalar_lea.sflag [#allocation6], %s4265_s28  ;;  %s4100_s30 = smov [#allocation5]  }
  0x4e   : > { %s4290_s25 = scalar_lea.hbm %s4930_s13, %s3357_s19  ;;  %s564_s19 = sshll.u32 %s557_s16, 4  ;;  %s565_s19 = int_to_ptr.vmem [resolvable:$true] %s564_s19 }
  0x4f   : > { %s3967_s0 = scalar_lea.vmem %s565_s19, 3072  ;;  %s3972_s20 = sshll.u32 %s4100_s30, 4  ;;  %s3973_s20 = int_to_ptr.vmem [resolvable:$false] %s3972_s20 }
  0x50   : > { %p3968_p13 = scmp.ne.s32.totalorder %s565_s19, %s3967_s0  ;;  %s3974_s14 = scalar_lea.vmem %s3973_s20, 6144 }
  0x51   : > { %s563_s18 = scalar_lea.hbm %s4932_s5, %s3608_s10  ;;  %p3975_p4 = scmp.lt.s32.totalorder %s565_s19, %s3973_s20 }
  0x52   : > { %p3970_p2 = pnand %p3968_p13, %p3928_p1  ;;  %p3976_p5 = scmp.lt.s32.totalorder %s3974_s14, %s3967_s0 }
  0x54   : > { %p3971_p3 = pneg %p3970_p2  ;;  %p3977_p6 = por %p3976_p5, %p3975_p4 }
  0x56   : > { %p3978_p7 = pnand %p3977_p6, %p3971_p3 }
  0x58   : > { %3981 = shalt.err (!%p3978_p7)
}
  0x59   : > { %s4101_s9 = smov 192   ;;  %s4102_s10 = smov 12  }
  0x5a   : > { %3624 = dma.hbm_to_vmem [thread:$0]  (!%p4267_p0), %s563_s18, 3072, %s565_s19, %s554_s23, %s4101_s9, %s4101_s9, %s4102_s10  }
  0x5b   : > { %s3995_s11 = scalar_lea.vmem %s4292_s17, 4096  ;;  %s4103_s28 = smov [#allocation10]  }
  0x5c   : > { %p3996_p8 = scmp.ne.s32.totalorder %s4292_s17, %s3995_s11  ;;  %s4000_s15 = sshll.u32 %s4103_s28, 4  ;;  %s4001_s15 = int_to_ptr.vmem [resolvable:$false] %s4000_s15 }
  0x5d   : > { %s4002_s16 = scalar_lea.vmem %s4001_s15, 8192  ;;  %p4003_p13 = scmp.lt.s32.totalorder %s4292_s17, %s4001_s15 }
  0x5e   : > { %p3998_p9 = pnand %p3996_p8, %p3928_p1  ;;  %p4004_p2 = scmp.lt.s32.totalorder %s4002_s16, %s3995_s11 }
  0x60   : > { %p3999_p10 = pneg %p3998_p9  ;;  %p4005_p3 = por %p4004_p2, %p4003_p13 }
  0x62   : > { %p4006_p4 = pnand %p4005_p3, %p3999_p10 }
  0x64   : > { %4009 = shalt.err (!%p4006_p4)
}
  0x65   : > { %s4104_s0 = smov 64   ;;  %s4105_s18 = smov 4  }
  0x66   : > { %3630 = dma.hbm_to_vmem [thread:$0]  (!%p4267_p0), %s4290_s25, 4096, %s4292_s17, %s4277_s24, %s4104_s0, %s4104_s0, %s4105_s18  }
  0x67   : > { %664 = sbr.rel (%p4296_p11) target bundleno = 3855 (0xf0f), region = 88  ;;  %s666_s19 = sand.u32 (!%p4296_p11), 1, %s4078_s1  }
  0x68   : > { %s3609_s23 = smul.u32 (!%p4296_p11), 192, %s666_s19  ;;  %s667_s30 = scalar_lea.sflag (!%p4296_p11), [#allocation6], %s666_s19 }
  0x6a   : > { %s4325_s20 = scalar_lea.vmem (!%p4296_p11), [#allocation5], %s3609_s23 }
  0x6c   : > { %4061 = dma.done.wait (%p4256_p12), %s667_s30, 3072  }
  0x6d   : > { %4063 = vsyncadd (%p4256_p12), %s667_s30, 4294964224  ;;  %s675_s14 = sand.u32 1, %s4243_s12   ;;  %s3218_s29 = sshll.u32 %s666_s19, 8 }
  0x6e   : > { %s676_s24 = scalar_lea.sflag [#allocation9], %s675_s14  ;;  %s4332_s25 = scalar_lea.vmem [#allocation8], %s3218_s29 }
  0x6f   : > { %4065 = dma.done.wait (%p4256_p12), %s676_s24, 8192  }
  0x70   : > { %4067 = vsyncadd (%p4256_p12), %s676_s24, 4294959104  ;;  %p788_p0 = scmp.lt.s32.totalorder %s4086_s21, 1  ;;  %s4933_s7 = sld [smem:[#allocation26_spill]] }
  0x71   : > { %s4934_s26 = sld [smem:[#allocation27_spill]]  ;;  %p3223_p12 = scmp.ne.s32.totalorder %s4086_s21, 0 }
  0x72   : > { %s4340_s17 = scalar_select %p788_p0, %s4086_s21, 1 }
  0x73   : > { %s4935_s22 = sld [smem:[#allocation28_spill]] }
  0x74   : > { %s3610_s15 = smul.u32 3, %s4340_s17  ;;  %s3359_s16 = sshll.u32 %s4340_s17, 6 }
  0x75   : > { %s3222_s0 = sshll.u32 %s4340_s17, 2  ;;  %s4937_s14 = sld [smem:[#allocation32_spill]] }
  0x76   : > { %s4355_s19 = scalar_lea.vmem %s4933_s7, %s3359_s16  ;;  %s4364_s9 = scalar_lea.vmem %s4884_s6, %s3610_s15 }
  0x77   : > { %s808_s11 = scalar_lea.vmem %s4934_s26, %s4340_s17  ;;  %s4936_s7 = sld [smem:[#allocation30_spill]] }
  0x78   : > { %s4384_s15 = scalar_lea.vmem [#allocation10], %s3218_s29  ;;  %s4938_s27 = sld [smem:[#allocation23_spill]] (!%p3223_p12) }
  0x79   : > { %s811_s1 = scalar_lea.vmem %s4935_s22, %s4340_s17  ;;  %824 = sbr.rel (%p3223_p12) target bundleno = 129 (0x81), region = 104 }
  0x7b   : > { %s818_s24 = scalar_lea.vmem %s4937_s14, %s4340_s17 }
  0x7d   : > { %s4378_s2 = scalar_lea.vmem %s4936_s7, %s3222_s0 }
  0x7e   : > { %v825_v0 = vld [vmem:[%s4938_s27] sm:$0xff]  ;;  %v826_v1 = vld [vmem:[%s4938_s27 + $0x8] sm:$0xff]  ;;  %v827_v2 = vld [vmem:[%s4938_s27 + $0x10] sm:$0xff] }
  0x7f   : > { %829 = vst [vmem:[#allocation2] sm:$0xff] %v825_v0  ;;  %830 = vst [vmem:[#allocation2 + $0x8] sm:$0xff] %v826_v1  ;;  %v828_v3 = vld [vmem:[%s4938_s27 + $0x18] sm:$0xff] }
  0x80   : > { %831 = vst [vmem:[#allocation2 + $0x10] sm:$0xff] %v827_v2  ;;  %832 = vst [vmem:[#allocation2 + $0x18] sm:$0xff] %v828_v3 }
  0x81 PF: > { %v3699_v7 = vld [vmem:[%s4325_s20 + $0xac] ss:$12 sps:$4 sm:$0xff]   ;;  %v3701_v8 = vld [vmem:[%s4325_s20 + $0xa8] ss:$12 sps:$4 sm:$0xff]   ;;  %v3704_v19 = vld [vmem:[%s4325_s20 + $0x90] ss:$12 sps:$4 sm:$0xff]   ;;  %s4939_s16 = scalar_lea.vmem %s4881_s3, %s4340_s17  ;;  %s4940_s30 = scalar_lea.vmem %s4882_s4, %s4340_s17 }
  0x82   : > { %1083 = vmatprep.subr.bf16.mxu0 %v3699_v7  ;;  %v3702_v18 = vld [vmem:[%s4325_s20 + $0x94] ss:$12 sps:$4 sm:$0xff]   ;;  %v3705_v20 = vld [vmem:[%s4325_s20 + $0x7c] ss:$12 sps:$4 sm:$0xff]   ;;  %v3707_v21 = vld [vmem:[%s4325_s20 + $0x78] ss:$12 sps:$4 sm:$0xff]   ;;  %s4942_s7 = scalar_lea.vmem %s4886_s8, %s4340_s17 }
  0x83   : > { %1084 = vmatpush1.bf16.msra.mxu0 %v3701_v8  ;;  %v3708_v24 = vld [vmem:[%s4325_s20 + $0x64] ss:$12 sps:$4 sm:$0xff]   ;;  %v3710_v25 = vld [vmem:[%s4325_s20 + $0x60] ss:$12 sps:$4 sm:$0xff]   ;;  %v3713_v29 = vld [vmem:[%s4325_s20 + $0x48] ss:$12 sps:$4 sm:$0xff]  }
  0x84   : > { %1085 = vmatprep.subr.bf16.mxu0 %v3702_v18  ;;  %v3711_v27 = vld [vmem:[%s4325_s20 + $0x4c] ss:$12 sps:$4 sm:$0xff]   ;;  %v3714_v30 = vld [vmem:[%s4325_s20 + $0x34] ss:$12 sps:$4 sm:$0xff]   ;;  %v3716_v31 = vld [vmem:[%s4325_s20 + $0x30] ss:$12 sps:$4 sm:$0xff]  }
  0x85   : > { %v3717_v32 = vld [vmem:[%s4325_s20 + $0x1c] ss:$12 sps:$4 sm:$0xff]   ;;  %v4106_v33 = vmov 0   ;;  %v3719_v34 = vld [vmem:[%s4325_s20 + $0x18] ss:$12 sps:$4 sm:$0xff]   ;;  %v4107_v2 = vmov 0.0  }
  0x86   : > { %v833_v4 = vld [vmem:[#allocation2] sm:$0xff]  ;;  %v834_v5 = vld [vmem:[#allocation2 + $0x8] sm:$0xff]  ;;  %1115 = vmatprep.mubr.bf16.mxu0 %v4106_v33  ;;  %v3723_v37 = vld [vmem:[%s4325_s20 + $0xb0] ss:$12 sps:$4 sm:$0xff]   ;;  %vm4108_vm0 = vmmov 0   ;;  %vm1211_vm1 = vcmask 523264  }
  0x87   : > { %839 = vadd.xlane.f32.xlu0 %v833_v4  ;;  %v835_v6 = vld [vmem:[#allocation2 + $0x10] sm:$0xff]  ;;  %v4409_v17 = vld [vmem:[#allocation2 + $0x18] sm:$0xff]  ;;  %1086 = vmatpush1.bf16.msra.mxu0 %v3704_v19  ;;  %v3722_v36 = vld [vmem:[%s4325_s20] ss:$12 sps:$4 sm:$0xff]   ;;  %v940_v19 = vlaneseq  ;;  %s4941_s10 = sld [smem:[#allocation24_spill]]  ;;  %vm1259_vm2 = vcmask 130048  }
  0x88   : > { %1087 = vmatprep.subr.bf16.mxu0 %v3705_v20  ;;  %v3720_v35 = vld [vmem:[%s4325_s20 + $0x4] ss:$12 sps:$4 sm:$0xff]   ;;  %3471 = vmatprep.subr.bf16.mxu1 %v3723_v37  ;;  %v3224_v51 = vld [vmem:[%s4939_s16] ss:$0 sm:$0xff]  ;;  %v3726_v61 = vld [vmem:[%s4325_s20 + $0x68] ss:$12 sps:$4 sm:$0xff]  }
  0x89   : > { %v3724_v38 = vld [vmem:[%s4325_s20 + $0x98] ss:$12 sps:$4 sm:$0xff]   ;;  %3472 = vmatpush3.bf16.msra.mxu1 %v3723_v37  ;;  %v3225_v55 = vld [vmem:[%s4940_s30] ss:$0 sm:$0xff]  ;;  %v3727_v62 = vld [vmem:[%s4325_s20 + $0x50] ss:$12 sps:$4 sm:$0xff]  }
  0x8a   : > { %3473 = vmatprep.subr.bf16.mxu1 %v3724_v38  ;;  %v3725_v57 = vld [vmem:[%s4325_s20 + $0x80] ss:$12 sps:$4 sm:$0xff]   ;;  %v3728_v63 = vld [vmem:[%s4325_s20 + $0x38] ss:$12 sps:$4 sm:$0xff]   ;;  %v3730_v1 = vld [vmem:[%s4325_s20 + $0x8] ss:$12 sps:$4 sm:$0xff]  }
  0x8b   : > { %841 = vadd.xlane.f32.xlu0 %v834_v5  ;;  %1088 = vmatpush1.bf16.msra.mxu0 %v3707_v21  ;;  %v3729_v0 = vld [vmem:[%s4325_s20 + $0x20] ss:$12 sps:$4 sm:$0xff]   ;;  %v4460_v20 = vshrl.u32 %v940_v19, 7  ;;  %s4109_s20 = smov 64   ;;  %p3338_p1 = scmp.ne.s32.totalorder %s4086_s21, 1 }
  0x8c   : > { %1089 = vmatprep.subr.bf16.mxu0 %v3708_v24  ;;  %s2801_s17 = sld [smem:[#allocation4]] (!%p3338_p1) }
  0x8d   : > { %3474 = vmatpush3.bf16.msra.mxu1 %v3724_v38  ;;  %v942_v21 = vsub.s32 0, %v4460_v20  ;;  %v946_v24 = vsub.s32 1, %v4460_v20 }
  0x8e   : > { %3475 = vmatprep.subr.bf16.mxu1 %v3725_v57 }
  0x8f   : > { %843 = vadd.xlane.f32.xlu0 %v835_v6  ;;  %1090 = vmatpush1.bf16.msra.mxu0 %v3710_v25 }
  0x90   : > { %1091 = vmatprep.subr.bf16.mxu0 %v3711_v27 }
  0x91   : > { %3476 = vmatpush3.bf16.msra.mxu1 %v3725_v57 }
  0x92   : > { %3477 = vmatprep.subr.bf16.mxu1 %v3726_v61 }
  0x93   : > { %1092 = vmatpush1.bf16.msra.mxu0 %v3713_v29 }
  0x94   : > { %1093 = vmatprep.subr.bf16.mxu0 %v3714_v30 }
  0x95   : > { %3478 = vmatpush3.bf16.msra.mxu1 %v3726_v61 }
  0x96   : > { %3479 = vmatprep.subr.bf16.mxu1 %v3727_v62 }
  0x97   : > { %1094 = vmatpush1.bf16.msra.mxu0 %v3716_v31 }
  0x98   : > { %1095 = vmatprep.subr.bf16.mxu0 %v3717_v32 }
  0x99   : > { %3480 = vmatpush3.bf16.msra.mxu1 %v3727_v62 }
  0x9a   : > { %3481 = vmatprep.subr.bf16.mxu1 %v3728_v63 }
  0x9b   : > { %1096 = vmatpush1.bf16.msra.mxu0 %v3719_v34 }
  0x9c   : > { %1097 = vmatprep.subr.bf16.mxu0 %v3720_v35 }
  0x9d   : > { %3482 = vmatpush3.bf16.msra.mxu1 %v3728_v63 }
  0x9e   : > { %3483 = vmatprep.subr.bf16.mxu1 %v3729_v0 }
  0x9f   : > { %1098 = vmatpush1.bf16.msra.mxu0 %v3722_v36 }
  0xa0   : > { %3497 = vmatprep.subr.bf16.mxu0 %v4107_v2 }
  0xa1   : > { %3484 = vmatpush3.bf16.msra.mxu1 %v3729_v0 }
  0xa2   : > { %3485 = vmatprep.subr.bf16.mxu1 %v3730_v1 }
  0xa5   : > { %3486 = vmatpush3.bf16.msra.mxu1 %v3730_v1 }
  0xa6   : > { %3491 = vmatprep.subr.bf16.mxu1 %v4107_v2 }
 0x110   : > { %v840_v9 = vpop.xlane.xlu0 %839 }
 0x111   : > { %v848_v10 = vmul.f32 0.0078125, %v840_v9 }
 0x113   : > { %v4401_v11 = vsub.f32 %v833_v4, %v848_v10 }
 0x114   : > { %v842_v12 = vpop.xlane.xlu0 %841 }
 0x115   : > { %v849_v13 = vmul.f32 0.0078125, %v842_v12  ;;  %v856_v14 = vmul.f32 %v4401_v11, %v4401_v11 }
 0x117   : > { %v4405_v15 = vsub.f32 %v834_v5, %v849_v13  ;;  %860 = vadd.xlane.f32.xlu1 %v856_v14 }
 0x118   : > { %v844_v22 = vpop.xlane.xlu0 %843 }
 0x119   : > { %v857_v16 = vmul.f32 %v4405_v15, %v4405_v15  ;;  %v850_v23 = vmul.f32 0.0078125, %v844_v22  ;;  %v938_v22 = vld [vmem:[%s4364_s9] sm:$0x7] }
 0x11b   : > { %862 = vadd.xlane.f32.xlu1 %v857_v16  ;;  %v4418_v26 = vsub.f32 %v835_v6, %v850_v23  ;;  %v4466_v23 = vrot.slane %v938_v22, %v942_v21 }
 0x11d   : > { %v858_v28 = vmul.f32 %v4418_v26, %v4418_v26 }
 0x11f   : > { %845 = vadd.xlane.f32.xlu1 %v4409_v17  ;;  %864 = vadd.xlane.f32.xlu0 %v858_v28  ;;  %v4472_v28 = vrot.slane %v938_v22, %v946_v24 }
 0x1a0   : > { %v861_v39 = vpop.xlane.xlu1 %860 }
 0x1a1   : > { %v868_v40 = vmul.f32 0.0078125, %v861_v39 }
 0x1a3   : > { %v872_v41 = vadd.f32 1e-05, %v868_v40 }
 0x1a4   : > { %v863_v42 = vpop.xlane.xlu1 %862 }
 0x1a5   : > { %3819 = vrsqrt.f32 %v872_v41  ;;  %v869_v43 = vmul.f32 0.0078125, %v863_v42 }
 0x1a7   : > { %v873_v44 = vadd.f32 1e-05, %v869_v43  ;;  %v950_v43 = vsub.s32 2, %v4460_v20 }
 0x1a8   : > { %v846_v45 = vpop.xlane.xlu1 %845  ;;  %v865_v3 = vpop.xlane.xlu0 %864 }
 0x1a9   : > { %3821 = vrsqrt.f32 %v873_v44  ;;  %v851_v46 = vmul.f32 0.0078125, %v846_v45  ;;  %v870_v4 = vmul.f32 0.0078125, %v865_v3  ;;  %v951_v44 = vrot.slane %v938_v22, %v950_v43 }
 0x1ab   : > { %v855_v47 = vsub.f32 %v4409_v17, %v851_v46  ;;  %v874_v5 = vadd.f32 1e-05, %v870_v4 }
 0x1ad   : > { %v859_v48 = vmul.f32 %v855_v47, %v855_v47  ;;  %3823 = vrsqrt.f32 %v874_v5 }
 0x1af   : > { %866 = vadd.xlane.f32.xlu1 %v859_v48 }
 0x1b2   : > { %v3820_v49 = vpop.eup %3819 }
 0x1b3   : > { %v880_v50 = vmul.f32 %v3820_v49, %v4401_v11 }
 0x1b5   : > { %v890_v54 = vmul.f32 %v3224_v51, %v880_v50 }
 0x1b6   : > { %v3822_v52 = vpop.eup %3821 }
 0x1b7   : > { %v881_v53 = vmul.f32 %v3822_v52, %v4405_v15  ;;  %v900_v58 = vadd.f32 %v3225_v55, %v890_v54 }
 0x1b9   : > { %v891_v56 = vmul.f32 %v3224_v51, %v881_v53 }
 0x1ba   : > { %v3824_v9 = vpop.eup %3823 }
 0x1bb   : > { %v901_v59 = vadd.f32 %v3225_v55, %v891_v56  ;;  %v882_v10 = vmul.f32 %v3824_v9, %v4418_v26 }
 0x1bd   : > { %v904_v60 = vpack.c.bf16 %v901_v59, %v900_v58  ;;  %v892_v11 = vmul.f32 %v3224_v51, %v882_v10  ;;  %v4507_v59 = vld [vmem:[%s4941_s10 + $0x8] sm:$0xff] }
 0x1bf   : > { %1116 = vmatmul.mubr.bf16.vlgmr.msra.gmra.mxu0 %v904_v60  ;;  %3487 = vmatprep.mubr.bf16.mxu1 %v904_v60  ;;  %v902_v15 = vadd.f32 %v3225_v55, %v892_v11 }
 0x1c0   : > { %1125 = vmatprep.mubr.bf16.mxu0 %v4106_v33 }
 0x238   : > { %v867_v6 = vpop.xlane.xlu1 %866 }
 0x239   : > { %v871_v7 = vmul.f32 0.0078125, %v867_v6 }
 0x23b   : > { %v875_v8 = vadd.f32 1e-05, %v871_v7 }
 0x23d   : > { %3825 = vrsqrt.f32 %v875_v8 }
 0x24a   : > { %v3826_v12 = vpop.eup %3825 }
 0x24b   : > { %v883_v13 = vmul.f32 %v3826_v12, %v855_v47 }
 0x24d   : > { %v893_v14 = vmul.f32 %v3224_v51, %v883_v13 }
 0x24f   : > { %v903_v16 = vadd.f32 %v3225_v55, %v893_v14  ;;  %v4501_v55 = vld [vmem:[%s4941_s10] sm:$0xff] }
 0x251   : > { %v905_v18 = vpack.c.bf16 %v903_v16, %v902_v15 }
 0x253   : > { %1126 = vmatmul.mubr.bf16.gmra.mxu0 %v905_v18  ;;  %3488 = vmatmul.mubr.bf16.vlgmr.msra.gmra.mxu1 %v905_v18 }
 0x254   : > { %3493 = vmatprep.mubr.msk.bf16.mxu1 %vm4108_vm0, %v4107_v2  ;;  %3499 = vmatprep.mubr.msk.bf16.mxu0 %vm4108_vm0, %v4107_v2 }
 0x27f   : > { %v1117_v25 = vpop.f32.mrf.mxu0 }
 0x280   : > { %v1118_v27 = vadd.f32 %v1117_v25, %v4466_v23 }
 0x281   : > { %v1119_v26 = vpop.f32.mrf.mxu0 }
 0x282   : > { %v1185_v32 = vmul.f32 0.125, %v1118_v27  ;;  %v1120_v34 = vadd.f32 %v1119_v26, %v4472_v28 }
 0x283   : > { %v1121_v29 = vpop.f32.mrf.mxu0 }
 0x284   : > { %v1122_v30 = vadd.f32 %v1121_v29, %v4466_v23 }
 0x285   : > { %v1123_v31 = vpop.f32.mrf.mxu0 }
 0x286   : > { %v1186_v35 = vmul.f32 0.125, %v1122_v30  ;;  %v1124_v36 = vadd.f32 %v1123_v31, %v4472_v28 }
 0x288   : > { %v1208_v37 = vpack.c.bf16 %v1186_v35, %v1185_v32  ;;  %v1209_v38 = vpack.c.bf16 %v1124_v36, %v1120_v34 }
 0x28a   : > { %1331 = vrot.lane.b32.xlu1 %v1208_v37, %s4109_s20  ;;  %1334 = vrot.lane.b32.xlu0 %v1209_v38, %s4109_s20  ;;  %v1216_v39 = vsel %vm1211_vm1, %v1209_v38, 0 }
 0x28b   : > { %3492 = vmatpush3.bf16.xpose.msra.mxu1 %v1216_v39 }
 0x28c   : > { %3503 = vmatprep.subr.bf16.mxu1 %v4107_v2 }
 0x292   : > { %3494 = vmatmul.mubr.msk.bf16.vlgmr.msra.gmra.mxu1 %vm1211_vm1, %v1208_v37 }
 0x293   : > { %3505 = vmatprep.mubr.msk.bf16.mxu1 %vm4108_vm0, %v4107_v2 }
 0x2fc   : > { %v1335_v40 = vpop.permute.xlu0 %1334  ;;  %v1332_v42 = vpop.permute.xlu1 %1331 }
 0x2fd   : > { %v1340_v41 = vsel %vm1211_vm1, %v1335_v40, 0 }
 0x2fe   : > { %3504 = vmatpush3.bf16.xpose.msra.mxu1 %v1340_v41 }
 0x2ff   : > { %3515 = vmatprep.subr.bf16.mxu1 %v4107_v2 }
 0x305   : > { %3506 = vmatmul.mubr.msk.bf16.vlgmr.msra.gmra.mxu1 %vm1211_vm1, %v1332_v42 }
 0x306   : > { %3523 = vmatprep.mubr.msk.bf16.mxu1 %vm4108_vm0, %v4107_v2 }
 0x313   : > { %v3489_v45 = vpop.f32.mrf.mxu1  ;;  %v1127_v35 = vpop.f32.mrf.mxu0 }
 0x314   : > { %v1179_v46 = vadd.f32 %v3489_v45, %v951_v44  ;;  %v1128_v41 = vadd.f32 %v1127_v35, %v4466_v23 }
 0x315   : > { %v1170_v47 = vpop.f32.mrf.mxu1  ;;  %v1129_v38 = vpop.f32.mrf.mxu0 }
 0x316   : > { %v1171_v51 = vadd.f32 %v1170_v47, %v951_v44  ;;  %v1130_v45 = vadd.f32 %v1129_v38, %v4472_v28 }
 0x317   : > { %v3490_v48 = vpop.f32.mrf.mxu1  ;;  %v1131_v39 = vpop.f32.mrf.mxu0 }
 0x318   : > { %v1182_v49 = vadd.f32 %v3490_v48, %v951_v44  ;;  %v1132_v42 = vadd.f32 %v1131_v39, %v4466_v23 }
 0x319   : > { %v1173_v50 = vpop.f32.mrf.mxu1  ;;  %v1133_v40 = vpop.f32.mrf.mxu0 }
 0x31a   : > { %v4492_v52 = vpack.c.bf16 %v1182_v49, %v1179_v46  ;;  %v1174_v53 = vadd.f32 %v1173_v50, %v951_v44  ;;  %v1134_v44 = vadd.f32 %v1133_v40, %v4472_v28  ;;  %v1187_v46 = vmul.f32 0.125, %v1128_v41 }
 0x31b   : > { %v1188_v47 = vmul.f32 0.125, %v1132_v42 }
 0x31c   : > { %v4494_v54 = vpack.c.bf16 %v1174_v53, %v1171_v51  ;;  %v4524_v48 = vpack.c.bf16 %v1134_v44, %v1130_v45 }
 0x31d   : > { %v4530_v50 = vpack.c.bf16 %v1188_v47, %v1187_v46 }
 0x31e   : > { %3498 = vmatpush3.bf16.msra.mxu0 %v4494_v54 }
 0x31f   : > { %3509 = vmatprep.subr.bf16.mxu0 %v4107_v2 }
 0x352   : > { %v1252_v56 = vpop.f32.mrf.mxu1 }
 0x353   : > { %v1253_v57 = vadd.f32 %v1252_v56, %v4501_v55 }
 0x354   : > { %v3495_v58 = vpop.f32.mrf.mxu1 }
 0x355   : > { %v1260_v60 = vsel %vm1259_vm2, %v1253_v57, -inf  ;;  %v4542_v58 = vld [vmem:[%s4355_s19 + $0x30] sm:$0xff]  }
 0x356   : > { %1261 = vmax.xlane.f32.xlu1 %v1260_v60  ;;  %v1255_v61 = vpop.f32.mrf.mxu1  ;;  %v4547_v60 = vld [vmem:[%s4355_s19 + $0x28] sm:$0xff]  }
 0x357   : > { %v1256_v62 = vadd.f32 %v1255_v61, %v4507_v59 }
 0x358   : > { %v3496_v63 = vpop.f32.mrf.mxu1 }
 0x359   : > { %v1263_v0 = vsel %vm1259_vm2, %v1256_v62, -inf }
 0x35a   : > { %1264 = vmax.xlane.f32.xlu0 %v1263_v0 }
 0x3c5   : > { %v1376_v1 = vpop.f32.mrf.mxu1 }
 0x3c6   : > { %v1377_v3 = vadd.f32 %v1376_v1, %v4501_v55 }
 0x3c7   : > { %v3507_v4 = vpop.f32.mrf.mxu1 }
 0x3c8   : > { %v1383_v5 = vsel %vm1259_vm2, %v1377_v3, -inf }
 0x3c9   : > { %1384 = vmax.xlane.f32.xlu0 %v1383_v5  ;;  %v1379_v6 = vpop.f32.mrf.mxu1  ;;  %v4554_v5 = vld [vmem:[%s4355_s19 + $0x18] sm:$0xff]  }
 0x3ca   : > { %v1380_v7 = vadd.f32 %v1379_v6, %v4507_v59 }
 0x3cb   : > { %v3508_v8 = vpop.f32.mrf.mxu1 }
 0x3cc   : > { %v1386_v9 = vsel %vm1259_vm2, %v1380_v7, -inf  ;;  %v4566_v8 = vld [vmem:[%s4355_s19 + $0x8] sm:$0xff]  }
 0x3cd   : > { %1387 = vmax.xlane.f32.xlu1 %v1386_v9  ;;  %v4571_v9 = vld [vmem:[%s4355_s19] sm:$0xff]  }
 0x3df   : > { %v1262_v10 = vpop.xlane.xlu1 %1261 }
 0x3e0   : > { %v1266_v11 = vsub.f32 %v1253_v57, %v1262_v10  ;;  %v3738_v10 = vld [vmem:[%s4355_s19 + $0x20] sm:$0xff]  }
 0x3e2   : > { %v1268_v12 = vmul.f32 1.442695, %v1266_v11 }
 0x3e3   : > { %v1265_v13 = vpop.xlane.xlu0 %1264 }
 0x3e4   : > { %3827 = vpow2.f32 %v1268_v12  ;;  %v1267_v14 = vsub.f32 %v1256_v62, %v1265_v13 }
 0x3e6   : > { %v1270_v15 = vmul.f32 1.442695, %v1267_v14 }
 0x3e8   : > { %3829 = vpow2.f32 %v1270_v15 }
 0x3f1   : > { %v3828_v16 = vpop.eup %3827 }
 0x3f2   : > { %v1272_v18 = vsel %vm1259_vm2, %v3828_v16, 0.0 }
 0x3f3   : > { %1273 = vadd.xlane.f32.xlu0 %v1272_v18 }
 0x3f5   : > { %v3830_v19 = vpop.eup %3829 }
 0x3f6   : > { %v1275_v22 = vsel %vm1259_vm2, %v3830_v19, 0.0 }
 0x3f7   : > { %1276 = vadd.xlane.f32.xlu1 %v1275_v22 }
 0x452   : > { %v1385_v25 = vpop.xlane.xlu0 %1384 }
 0x453   : > { %v1389_v26 = vsub.f32 %v1377_v3, %v1385_v25 }
 0x455   : > { %v1391_v27 = vmul.f32 1.442695, %v1389_v26  ;;  %v1612_v26 = vsel %vm1211_vm1, %v4524_v48, 0 }
 0x456   : > { %v1388_v29 = vpop.xlane.xlu1 %1387 }
 0x457   : > { %3831 = vpow2.f32 %v1391_v27  ;;  %v1390_v30 = vsub.f32 %v1380_v7, %v1388_v29  ;;  %v4559_v7 = vld [vmem:[%s4355_s19 + $0x10] sm:$0xff]  }
 0x459   : > { %v1393_v31 = vmul.f32 1.442695, %v1390_v30 }
 0x45b   : > { %3833 = vpow2.f32 %v1393_v31 }
 0x464   : > { %v3832_v32 = vpop.eup %3831 }
 0x465   : > { %v1395_v34 = vsel %vm1259_vm2, %v3832_v32, 0.0 }
 0x466   : > { %1396 = vadd.xlane.f32.xlu0 %v1395_v34 }
 0x468   : > { %v3834_v36 = vpop.eup %3833 }
 0x469   : > { %v1398_v37 = vsel %vm1259_vm2, %v3834_v36, 0.0 }
 0x46a   : > { %1399 = vadd.xlane.f32.xlu1 %v1398_v37 }
 0x47b   : > { %1729 = vrot.lane.b32.xlu1 %v4524_v48, %s4109_s20 }
 0x47c   : > { %1409 = vrot.lane.b32.xlu0 %v4494_v54, %s4109_s20  ;;  %v1274_v49 = vpop.xlane.xlu0 %1273  ;;  %v4538_v54 = vld [vmem:[%s4355_s19 + $0x38] sm:$0xff]  }
 0x47d   : > { %3835 = vrcp.f32 %v1274_v49  ;;  %3516 = vmatpush3.bf16.msra.mxu1 %v4538_v54 }
 0x47e   : > { %3517 = vmatprep.subr.bf16.mxu1 %v4107_v2 }
 0x47f   : > { %1726 = vrot.lane.b32.xlu1 %v4530_v50, %s4109_s20 }
 0x480   : > { %v1277_v23 = vpop.xlane.xlu1 %1276 }
 0x481   : > { %3837 = vrcp.f32 %v1277_v23  ;;  %3518 = vmatpush3.bf16.msra.mxu1 %v4542_v58 }
 0x482   : > { %3519 = vmatprep.subr.bf16.mxu1 %v4107_v2 }
 0x485   : > { %3520 = vmatpush3.bf16.msra.mxu1 %v4547_v60 }
 0x486   : > { %3521 = vmatprep.subr.bf16.mxu1 %v4107_v2 }
 0x489   : > { %3522 = vmatpush3.bf16.msra.mxu1 %v3738_v10 }
 0x48a   : > { %v3836_v28 = vpop.eup %3835  ;;  %3539 = vmatprep.subr.bf16.mxu1 %v4107_v2 }
 0x48b   : > { %v1282_v53 = vmul.f32 %v3836_v28, %v3828_v16 }
 0x48e   : > { %v3838_v51 = vpop.eup %3837 }
 0x48f   : > { %v1283_v56 = vmul.f32 %v3838_v51, %v3830_v19 }
 0x491   : > { %v1284_v57 = vpack.c.bf16 %v1283_v56, %v1282_v53 }
 0x493   : > { %3500 = vmatmul.mubr.msk.bf16.vlgmr.msra.gmra.mxu0 %vm1259_vm2, %v1284_v57 }
 0x494   : > { %3511 = vmatprep.mubr.msk.bf16.mxu0 %vm4108_vm0, %v4107_v2 }
 0x4ef   : > { %v1397_v61 = vpop.xlane.xlu0 %1396 }
 0x4f0   : > { %3839 = vrcp.f32 %v1397_v61 }
 0x4f3   : > { %v1400_v62 = vpop.xlane.xlu1 %1399  ;;  %v1410_v63 = vpop.permute.xlu0 %1409 }
 0x4f4   : > { %3841 = vrcp.f32 %v1400_v62  ;;  %3510 = vmatpush3.bf16.msra.mxu0 %v1410_v63 }
 0x4f5   : > { %3527 = vmatprep.subr.bf16.mxu0 %v4107_v2 }
 0x4f7   : > { %v1730_v27 = vpop.permute.xlu1 %1729 }
 0x4f8   : > { %v1735_v29 = vsel %vm1211_vm1, %v1730_v27, 0 }
 0x4fb   : > { %v1727_v30 = vpop.permute.xlu1 %1726 }
 0x4fd   : > { %v3840_v0 = vpop.eup %3839 }
 0x4fe   : > { %v1405_v3 = vmul.f32 %v3840_v0, %v3832_v32 }
 0x501   : > { %v3842_v1 = vpop.eup %3841 }
 0x502   : > { %v1406_v4 = vmul.f32 %v3842_v1, %v3834_v36 }
 0x504   : > { %v1407_v6 = vpack.c.bf16 %v1406_v4, %v1405_v3 }
 0x506   : > { %3512 = vmatmul.mubr.msk.bf16.vlgmr.msra.gmra.mxu0 %vm1259_vm2, %v1407_v6 }
 0x507   : > { %3528 = vmatpush3.bf16.msra.mxu0 %v4554_v5  ;;  %3535 = vmatprep.mubr.msk.bf16.mxu0 %vm4108_vm0, %v4107_v2 }
 0x508   : > { %3529 = vmatprep.subr.bf16.mxu0 %v4107_v2 }
 0x50b   : > { %3530 = vmatpush3.bf16.msra.mxu0 %v4559_v7 }
 0x50c   : > { %3531 = vmatprep.subr.bf16.mxu0 %v4107_v2 }
 0x50f   : > { %3532 = vmatpush3.bf16.msra.mxu0 %v4566_v8 }
 0x510   : > { %3533 = vmatprep.subr.bf16.mxu0 %v4107_v2 }
 0x513   : > { %3534 = vmatpush3.bf16.msra.mxu0 %v4571_v9 }
 0x514   : > { %3545 = vmatprep.subr.bf16.mxu0 %v4107_v2 }
 0x553   : > { %v1322_v11 = vpop.f32.mrf.mxu0 }
 0x555   : > { %v3501_v12 = vpop.f32.mrf.mxu0 }
 0x557   : > { %v1325_v13 = vpop.f32.mrf.mxu0 }
 0x558   : > { %v1329_v14 = vpack.c.bf16 %v1325_v13, %v1322_v11 }
 0x559   : > { %v3502_v15 = vpop.f32.mrf.mxu0 }
 0x55a   : > { %3536 = vmatmul.mubr.msk.bf16.vlgmr.msra.gmra.mxu0 %vm1211_vm1, %v1329_v14 }
 0x55b   : > { %3546 = vmatpush3.bf16.msra.mxu0 %v4492_v52  ;;  %3547 = vmatprep.mubr.msk.bf16.mxu0 %vm4108_vm0, %v4107_v2 }
 0x55c   : > { %3557 = vmatprep.subr.bf16.mxu0 %v4107_v2 }
 0x5c6   : > { %v1449_v16 = vpop.f32.mrf.mxu0 }
 0x5c8   : > { %v3513_v18 = vpop.f32.mrf.mxu0 }
 0x5c9   : > { %v3899_v18 = vld [vmem:[#allocation2] sm:$0xff] }
 0x5ca   : > { %v1452_v19 = vpop.f32.mrf.mxu0 }
 0x5cb   : > { %v1456_v22 = vpack.c.bf16 %v1452_v19, %v1449_v16 }
 0x5cc   : > { %v3514_v25 = vpop.f32.mrf.mxu0 }
 0x5cd   : > { %3524 = vmatmul.mubr.msk.bf16.vlgmr.msra.gmra.mxu1 %vm1211_vm1, %v1456_v22  ;;  %v4620_v25 = vld [vmem:[%s4942_s7] ss:$0 sm:$0xff] }
 0x5ce   : > { %3540 = vmatpush3.bf16.xpose.msra.mxu1 %v1612_v26  ;;  %3541 = vmatprep.mubr.msk.bf16.mxu1 %vm4108_vm0, %v4107_v2 }
 0x5cf   : > { %3551 = vmatprep.subr.bf16.mxu1 %v4107_v2 }
 0x5d5   : > { %3542 = vmatmul.mubr.msk.bf16.vlgmr.msra.gmra.mxu1 %vm1211_vm1, %v4530_v50 }
 0x5d6   : > { %3552 = vmatpush3.bf16.xpose.msra.mxu1 %v1735_v29  ;;  %3553 = vmatprep.mubr.msk.bf16.mxu1 %vm4108_vm0, %v4107_v2  ;;  %v3900_v29 = vld [vmem:[#allocation2 + $0x8] sm:$0xff] }
 0x5d7   : > { %3563 = vmatprep.subr.bf16.mxu1 %v4107_v2 }
 0x5dd   : > { %3554 = vmatmul.mubr.msk.bf16.vlgmr.msra.gmra.mxu1 %vm1211_vm1, %v1727_v30 }
 0x5de   : > { %3564 = vmatpush3.bf16.msra.mxu1 %v4538_v54  ;;  %3571 = vmatprep.mubr.msk.bf16.mxu1 %vm4108_vm0, %v4107_v2 }
 0x5df   : > { %3565 = vmatprep.subr.bf16.mxu1 %v4107_v2 }
 0x5e2   : > { %3566 = vmatpush3.bf16.msra.mxu1 %v4542_v58 }
 0x5e3   : > { %3567 = vmatprep.subr.bf16.mxu1 %v4107_v2 }
 0x5e6   : > { %3568 = vmatpush3.bf16.msra.mxu1 %v4547_v60 }
 0x5e7   : > { %3569 = vmatprep.subr.bf16.mxu1 %v4107_v2 }
 0x5ea   : > { %3570 = vmatpush3.bf16.msra.mxu1 %v3738_v10 }
 0x61a   : > { %v1586_v31 = vpop.f32.mrf.mxu0 }
 0x61c   : > { %v3537_v32 = vpop.f32.mrf.mxu0 }
 0x61e   : > { %v1589_v34 = vpop.f32.mrf.mxu0 }
 0x620   : > { %v3538_v35 = vpop.f32.mrf.mxu0 }
 0x68d   : > { %v1518_v36 = vpop.f32.mrf.mxu1 }
 0x68e   : > { %v1587_v14 = vadd.f32 %v1586_v31, %v1518_v36 }
 0x68f   : > { %v3525_v37 = vpop.f32.mrf.mxu1 }
 0x690   : > { %v1593_v19 = vadd.f32 %v3899_v18, %v1587_v14  ;;  %v3739_v18 = vld [vmem:[%s4332_s25 + $0xe0] ss:$16 sps:$4 sm:$0xff]  }
 0x691   : > { %v1521_v38 = vpop.f32.mrf.mxu1 }
 0x692   : > { %v1590_v22 = vadd.f32 %v1589_v34, %v1521_v38  ;;  %v4624_v27 = vadd.f32 %v4620_v25, %v1593_v19  ;;  %v3742_v19 = vld [vmem:[%s4332_s25 + $0xe8] ss:$16 sps:$4 sm:$0xff]  }
 0x693   : > { %v3526_v39 = vpop.f32.mrf.mxu1 }
 0x694   : > { %v1594_v30 = vadd.f32 %v3900_v29, %v1590_v22  ;;  %v3747_v22 = vld [vmem:[%s4332_s25 + $0xc4] ss:$16 sps:$4 sm:$0xff]   ;;  %v3748_v29 = vld [vmem:[%s4332_s25 + $0xc8] ss:$16 sps:$4 sm:$0xff]  }
 0x695   : > { %v1648_v40 = vpop.f32.mrf.mxu1 }
 0x696   : > { %v1649_v41 = vadd.f32 %v1648_v40, %v4501_v55  ;;  %v4628_v31 = vadd.f32 %v4620_v25, %v1594_v30  ;;  %v3753_v30 = vld [vmem:[%s4332_s25 + $0xa4] ss:$16 sps:$4 sm:$0xff]  }
 0x697   : > { %v3543_v42 = vpop.f32.mrf.mxu1 }
 0x698   : > { %v1655_v44 = vsel %vm1259_vm2, %v1649_v41, -inf }
 0x699   : > { %1656 = vmax.xlane.f32.xlu1 %v1655_v44  ;;  %v1651_v45 = vpop.f32.mrf.mxu1 }
 0x69a   : > { %v1652_v46 = vadd.f32 %v1651_v45, %v4507_v59 }
 0x69b   : > { %v3544_v47 = vpop.f32.mrf.mxu1 }
 0x69c   : > { %v1658_v48 = vsel %vm1259_vm2, %v1652_v46, -inf }
 0x69d   : > { %1659 = vmax.xlane.f32.xlu0 %v1658_v48  ;;  %v1771_v49 = vpop.f32.mrf.mxu1 }
 0x69e   : > { %v1772_v50 = vadd.f32 %v1771_v49, %v4501_v55 }
 0x69f   : > { %v3555_v23 = vpop.f32.mrf.mxu1 }
 0x6a0   : > { %v1778_v28 = vsel %vm1259_vm2, %v1772_v50, -inf }
 0x6a1   : > { %1779 = vmax.xlane.f32.xlu0 %v1778_v28  ;;  %v1774_v51 = vpop.f32.mrf.mxu1 }
 0x6a2   : > { %v1775_v53 = vadd.f32 %v1774_v51, %v4507_v59 }
 0x6a3   : > { %v3556_v56 = vpop.f32.mrf.mxu1 }
 0x6a4   : > { %v1781_v57 = vsel %vm1259_vm2, %v1775_v53, -inf }
 0x6a5   : > { %1782 = vmax.xlane.f32.xlu0 %v1781_v57 }
 0x722   : > { %v1657_v54 = vpop.xlane.xlu1 %1656 }
 0x723   : > { %v1661_v58 = vsub.f32 %v1649_v41, %v1657_v54 }
 0x725   : > { %v1663_v60 = vmul.f32 1.442695, %v1661_v58 }
 0x726   : > { %v1660_v61 = vpop.xlane.xlu0 %1659 }
 0x727   : > { %3843 = vpow2.f32 %v1663_v60  ;;  %v1662_v62 = vsub.f32 %v1652_v46, %v1660_v61 }
 0x729   : > { %v1665_v63 = vmul.f32 1.442695, %v1662_v62 }
 0x72a   : > { %v1780_v0 = vpop.xlane.xlu0 %1779 }
 0x72b   : > { %3845 = vpow2.f32 %v1665_v63  ;;  %v1784_v55 = vsub.f32 %v1772_v50, %v1780_v0 }
 0x72d   : > { %v1786_v1 = vmul.f32 1.442695, %v1784_v55 }
 0x72e   : > { %v1783_v3 = vpop.xlane.xlu0 %1782 }
 0x72f   : > { %3847 = vpow2.f32 %v1786_v1  ;;  %v1785_v4 = vsub.f32 %v1775_v53, %v1783_v3  ;;  %v3901_v1 = vld [vmem:[#allocation2 + $0x10] sm:$0xff] }
 0x731   : > { %v1788_v6 = vmul.f32 1.442695, %v1785_v4 }
 0x733   : > { %3849 = vpow2.f32 %v1788_v6 }
 0x734   : > { %v3844_v59 = vpop.eup %3843 }
 0x735   : > { %v1667_v10 = vsel %vm1259_vm2, %v3844_v59, 0.0 }
 0x736   : > { %1668 = vadd.xlane.f32.xlu1 %v1667_v10 }
 0x738   : > { %v3846_v11 = vpop.eup %3845 }
 0x739   : > { %v1670_v12 = vsel %vm1259_vm2, %v3846_v11, 0.0 }
 0x73a   : > { %1671 = vadd.xlane.f32.xlu0 %v1670_v12 }
 0x73c   : > { %v3848_v13 = vpop.eup %3847 }
 0x73d   : > { %v1790_v15 = vsel %vm1259_vm2, %v3848_v13, 0.0 }
 0x73e   : > { %1791 = vadd.xlane.f32.xlu1 %v1790_v15 }
 0x740   : > { %v3850_v16 = vpop.eup %3849 }
 0x741   : > { %v1793_v26 = vsel %vm1259_vm2, %v3850_v16, 0.0 }
 0x742   : > { %1794 = vadd.xlane.f32.xlu0 %v1793_v26  ;;  %v3745_v26 = vld [vmem:[%s4332_s25 + $0xc0] ss:$16 sps:$4 sm:$0xff]  }
 0x746   : > { %1953 = vadd.xlane.f32.xlu0 %v4624_v27 }
 0x74a   : > { %1955 = vadd.xlane.f32.xlu0 %v4628_v31 }
 0x74f   : > { %1804 = vrot.lane.b32.xlu1 %v4492_v52, %s4109_s20  ;;  %s4946_s20 = sld [smem:[#allocation35_spill]] (!%p3338_p1) }
 0x755   : > { %s4947_s9 = smov (!%p3338_p1), %s4946_s20 }
 0x7bf   : > { %v1669_v32 = vpop.xlane.xlu1 %1668 }
 0x7c0   : > { %3851 = vrcp.f32 %v1669_v32  ;;  %v3756_v32 = vld [vmem:[%s4332_s25 + $0xac] ss:$16 sps:$4 sm:$0xff]  }
 0x7c3   : > { %v1672_v34 = vpop.xlane.xlu0 %1671 }
 0x7c4   : > { %3853 = vrcp.f32 %v1672_v34  ;;  %v3751_v34 = vld [vmem:[%s4332_s25 + $0xa0] ss:$16 sps:$4 sm:$0xff]  }
 0x7c7   : > { %v1792_v35 = vpop.xlane.xlu1 %1791 }
 0x7c8   : > { %3855 = vrcp.f32 %v1792_v35  ;;  %v3754_v35 = vld [vmem:[%s4332_s25 + $0xa8] ss:$16 sps:$4 sm:$0xff]  }
 0x7cb   : > { %v1795_v36 = vpop.xlane.xlu0 %1794  ;;  %v1805_v46 = vpop.permute.xlu1 %1804 }
 0x7cc   : > { %3857 = vrcp.f32 %v1795_v36  ;;  %v3757_v36 = vld [vmem:[%s4332_s25 + $0x80] ss:$16 sps:$4 sm:$0xff]  }
 0x7cd   : > { %v3852_v37 = vpop.eup %3851 }
 0x7ce   : > { %v1677_v42 = vmul.f32 %v3852_v37, %v3844_v59  ;;  %v3759_v37 = vld [vmem:[%s4332_s25 + $0x84] ss:$16 sps:$4 sm:$0xff]  }
 0x7cf   : > { %v1954_v38 = vpop.xlane.xlu0 %1953 }
 0x7d0   : > { %v1961_v39 = vmul.f32 0.0078125, %v1954_v38  ;;  %v3760_v38 = vld [vmem:[%s4332_s25 + $0x88] ss:$16 sps:$4 sm:$0xff]  }
 0x7d1   : > { %v3854_v40 = vpop.eup %3853 }
 0x7d2   : > { %v4634_v41 = vsub.f32 %v4624_v27, %v1961_v39  ;;  %v1678_v44 = vmul.f32 %v3854_v40, %v3846_v11  ;;  %v3762_v39 = vld [vmem:[%s4332_s25 + $0x8c] ss:$16 sps:$4 sm:$0xff]   ;;  %v3765_v40 = vld [vmem:[%s4332_s25 + $0x64] ss:$16 sps:$4 sm:$0xff]  }
 0x7d3   : > { %v1956_v0 = vpop.xlane.xlu0 %1955 }
 0x7d4   : > { %v1679_v45 = vpack.c.bf16 %v1678_v44, %v1677_v42  ;;  %v1969_v52 = vmul.f32 %v4634_v41, %v4634_v41  ;;  %v1962_v6 = vmul.f32 0.0078125, %v1956_v0  ;;  %v3768_v42 = vld [vmem:[%s4332_s25 + $0x6c] ss:$16 sps:$4 sm:$0xff]   ;;  %v3763_v44 = vld [vmem:[%s4332_s25 + $0x60] ss:$16 sps:$4 sm:$0xff]  }
 0x7d5   : > { %v3856_v47 = vpop.eup %3855 }
 0x7d6   : > { %3548 = vmatmul.mubr.msk.bf16.vlgmr.msra.gmra.mxu0 %vm1259_vm2, %v1679_v45  ;;  %1973 = vadd.xlane.f32.xlu1 %v1969_v52  ;;  %v1800_v49 = vmul.f32 %v3856_v47, %v3848_v13  ;;  %v4662_v13 = vsub.f32 %v4628_v31, %v1962_v6  ;;  %v3766_v45 = vld [vmem:[%s4332_s25 + $0x68] ss:$16 sps:$4 sm:$0xff]   ;;  %v3771_v52 = vld [vmem:[%s4332_s25 + $0x44] ss:$16 sps:$4 sm:$0xff]   ;;  %v3769_v47 = vld [vmem:[%s4332_s25 + $0x40] ss:$16 sps:$4 sm:$0xff]  }
 0x7d7   : > { %3558 = vmatpush3.bf16.msra.mxu0 %v1805_v46  ;;  %3559 = vmatprep.mubr.msk.bf16.mxu0 %vm4108_vm0, %v4107_v2  ;;  %v3774_v46 = vld [vmem:[%s4332_s25 + $0x4c] ss:$16 sps:$4 sm:$0xff]   ;;  %v4718_v6 = vld [vmem:[%s808_s11] ss:$0 sm:$0xff] }
 0x7d8   : > { %3575 = vmatprep.subr.bf16.mxu0 %v4107_v2  ;;  %v1970_v15 = vmul.f32 %v4662_v13, %v4662_v13 }
 0x7d9   : > { %v3858_v48 = vpop.eup %3857 }
 0x7da   : > { %v1801_v50 = vmul.f32 %v3858_v48, %v3850_v16  ;;  %v3741_v16 = vld [vmem:[%s4332_s25 + $0xe4] ss:$16 sps:$4 sm:$0xff]   ;;  %v3772_v48 = vld [vmem:[%s4332_s25 + $0x48] ss:$16 sps:$4 sm:$0xff]  }
 0x7db   : > { %2233 = vmatprep.subr.bf16.mxu1 %v3741_v16 }
 0x7dc   : > { %v1802_v23 = vpack.c.bf16 %v1801_v50, %v1800_v49  ;;  %v3777_v49 = vld [vmem:[%s4332_s25 + $0x24] ss:$16 sps:$4 sm:$0xff]   ;;  %v3780_v50 = vld [vmem:[%s4332_s25 + $0x2c] ss:$16 sps:$4 sm:$0xff]  }
 0x7de   : > { %3560 = vmatmul.mubr.msk.bf16.vlgmr.msra.gmra.mxu0 %vm1259_vm2, %v1802_v23  ;;  %v3775_v23 = vld [vmem:[%s4332_s25 + $0x20] ss:$16 sps:$4 sm:$0xff]  }
 0x7df   : > { %3576 = vmatpush3.bf16.msra.mxu0 %v4554_v5  ;;  %3583 = vmatprep.mubr.msk.bf16.mxu0 %vm4108_vm0, %v4107_v2 }
 0x7e0   : > { %3577 = vmatprep.subr.bf16.mxu0 %v4107_v2 }
 0x7e3   : > { %3578 = vmatpush3.bf16.msra.mxu0 %v4559_v7 }
 0x7e4   : > { %3579 = vmatprep.subr.bf16.mxu0 %v4107_v2 }
 0x7e7   : > { %3580 = vmatpush3.bf16.msra.mxu0 %v4566_v8 }
 0x7e8   : > { %3581 = vmatprep.subr.bf16.mxu0 %v4107_v2 }
 0x7eb   : > { %3582 = vmatpush3.bf16.msra.mxu0 %v4571_v9 }
 0x896   : > { %v1717_v28 = vpop.f32.mrf.mxu0 }
 0x898   : > { %v3549_v51 = vpop.f32.mrf.mxu0 }
 0x899   : > { %v3783_v51 = vld [vmem:[%s4332_s25 + $0x4] ss:$16 sps:$4 sm:$0xff]  }
 0x89a   : > { %v1720_v53 = vpop.f32.mrf.mxu0 }
 0x89b   : > { %v1724_v56 = vpack.c.bf16 %v1720_v53, %v1717_v28  ;;  %v3778_v28 = vld [vmem:[%s4332_s25 + $0x28] ss:$16 sps:$4 sm:$0xff]   ;;  %v3786_v53 = vld [vmem:[%s4332_s25 + $0xc] ss:$16 sps:$4 sm:$0xff]  }
 0x89c   : > { %v3550_v5 = vpop.f32.mrf.mxu0 }
 0x89d   : > { %3584 = vmatmul.mubr.msk.bf16.vlgmr.msra.gmra.mxu0 %vm1211_vm1, %v1724_v56  ;;  %v3781_v56 = vld [vmem:[%s4332_s25] ss:$16 sps:$4 sm:$0xff]   ;;  %v3784_v5 = vld [vmem:[%s4332_s25 + $0x8] ss:$16 sps:$4 sm:$0xff]  }
 0x89e   : > { %v1844_v57 = vpop.f32.mrf.mxu0  ;;  %2318 = vmatprep.mubr.bf16.mxu0 %v4106_v33 }
 0x8a0   : > { %v3561_v54 = vpop.f32.mrf.mxu0 }
 0x8a2   : > { %v1847_v7 = vpop.f32.mrf.mxu0 }
 0x8a3   : > { %v1851_v58 = vpack.c.bf16 %v1847_v7, %v1844_v57  ;;  %v1974_v57 = vpop.xlane.xlu1 %1973 }
 0x8a4   : > { %v3562_v60 = vpop.f32.mrf.mxu0  ;;  %v1981_v54 = vmul.f32 0.0078125, %v1974_v57  ;;  %v3818_v57 = vld [vmem:[%s4384_s15 + $0x80] sm:$0xff]  }
 0x8a5   : > { %3572 = vmatmul.mubr.msk.bf16.vlgmr.msra.gmra.mxu1 %vm1211_vm1, %v1851_v58 }
 0x8a6   : > { %2265 = vmatprep.mubr.bf16.mxu1 %v4106_v33  ;;  %2234 = vmatpush1.bf16.msra.mxu1 %v3739_v18  ;;  %v1985_v60 = vadd.f32 1e-05, %v1981_v54 }
 0x8a7   : > { %2235 = vmatprep.subr.bf16.mxu1 %v3747_v22  ;;  %v3789_v22 = vld [vmem:[%s4384_s15 + $0x38] sm:$0xff]  }
 0x8a8   : > { %3859 = vrsqrt.f32 %v1985_v60 }
 0x8aa   : > { %2236 = vmatpush1.bf16.msra.mxu1 %v3745_v26  ;;  %v3791_v26 = vld [vmem:[%s4384_s15 + $0x70] sm:$0xff]  }
 0x8ab   : > { %2237 = vmatprep.subr.bf16.mxu1 %v3753_v30  ;;  %v3793_v30 = vld [vmem:[%s4384_s15 + $0x30] sm:$0xff]  }
 0x8ae   : > { %2238 = vmatpush1.bf16.msra.mxu1 %v3751_v34  ;;  %v3796_v34 = vld [vmem:[%s4384_s15 + $0xe8] sm:$0xff]  }
 0x8af   : > { %2239 = vmatprep.subr.bf16.mxu1 %v3759_v37  ;;  %v3799_v37 = vld [vmem:[%s4384_s15 + $0x60] sm:$0xff]  }
 0x8b2   : > { %2240 = vmatpush1.bf16.msra.mxu1 %v3757_v36  ;;  %v3798_v36 = vld [vmem:[%s4384_s15 + $0xa8] sm:$0xff]  }
 0x8b3   : > { %2241 = vmatprep.subr.bf16.mxu1 %v3765_v40  ;;  %v3802_v40 = vld [vmem:[%s4384_s15 + $0xa0] sm:$0xff]  }
 0x8b6   : > { %2242 = vmatpush1.bf16.msra.mxu1 %v3763_v44  ;;  %v3804_v44 = vld [vmem:[%s4384_s15 + $0xd8] sm:$0xff]  }
 0x8b7   : > { %2243 = vmatprep.subr.bf16.mxu1 %v3771_v52  ;;  %v3806_v52 = vld [vmem:[%s4384_s15 + $0x98] sm:$0xff]  }
 0x8ba   : > { %2244 = vmatpush1.bf16.msra.mxu1 %v3769_v47  ;;  %v3808_v47 = vld [vmem:[%s4384_s15 + $0xd0] sm:$0xff]  }
 0x8bb   : > { %2245 = vmatprep.subr.bf16.mxu1 %v3777_v49  ;;  %v3810_v49 = vld [vmem:[%s4384_s15 + $0x90] sm:$0xff]  }
 0x8be   : > { %2246 = vmatpush1.bf16.msra.mxu1 %v3775_v23  ;;  %v3812_v23 = vld [vmem:[%s4384_s15 + $0xc8] sm:$0xff]  }
 0x8bf   : > { %2247 = vmatprep.subr.bf16.mxu1 %v3783_v51  ;;  %v3814_v51 = vld [vmem:[%s4384_s15 + $0x88] sm:$0xff]  }
 0x8c2   : > { %2248 = vmatpush1.bf16.msra.mxu1 %v3781_v56  ;;  %v3816_v56 = vld [vmem:[%s4384_s15 + $0xc0] sm:$0xff]  }
 0x95d   : > { %v1933_v2 = vpop.f32.mrf.mxu0 }
 0x95f   : > { %v3585_v8 = vpop.f32.mrf.mxu0 }
 0x961   : > { %v1936_v9 = vpop.f32.mrf.mxu0 }
 0x963   : > { %v3586_v61 = vpop.f32.mrf.mxu0 }
 0x965   : > { %v1889_v62 = vpop.f32.mrf.mxu1 }
 0x966   : > { %v1934_v63 = vadd.f32 %v1933_v2, %v1889_v62 }
 0x967   : > { %v3573_v55 = vpop.f32.mrf.mxu1 }
 0x968   : > { %v1940_v3 = vadd.f32 %v3901_v1, %v1934_v63 }
 0x969   : > { %v1892_v4 = vpop.f32.mrf.mxu1 }
 0x96a   : > { %v4657_v59 = vadd.f32 %v4620_v25, %v1940_v3  ;;  %v1937_v10 = vadd.f32 %v1936_v9, %v1892_v4  ;;  %v3860_v3 = vpop.eup %3859 }
 0x96b   : > { %v3574_v11 = vpop.f32.mrf.mxu1  ;;  %v1993_v4 = vmul.f32 %v3860_v3, %v4634_v41 }
 0x96c   : > { %v1941_v12 = vadd.f32 %v1937_v10, %v4409_v17  ;;  %1957 = vadd.xlane.f32.xlu0 %v4657_v59  ;;  %v3744_v17 = vld [vmem:[%s4332_s25 + $0xec] ss:$16 sps:$4 sm:$0xff]  }
 0x96d   : > { %2286 = vmatprep.subr.bf16.mxu0 %v3744_v17 }
 0x96e   : > { %v4665_v14 = vadd.f32 %v4620_v25, %v1941_v12  ;;  %2287 = vmatpush1.bf16.msra.mxu0 %v3742_v19  ;;  %v3750_v25 = vld [vmem:[%s4332_s25 + $0xcc] ss:$16 sps:$4 sm:$0xff]   ;;  %v2003_v12 = vmul.f32 %v4718_v6, %v1993_v4 }
 0x96f   : > { %2288 = vmatprep.subr.bf16.mxu0 %v3750_v25  ;;  %v3788_v19 = vld [vmem:[%s4384_s15 + $0xf8] sm:$0xff]  }
 0x970   : > { %1959 = vadd.xlane.f32.xlu0 %v4665_v14  ;;  %v3790_v25 = vld [vmem:[%s4384_s15 + $0xb8] sm:$0xff]  }
 0x972   : > { %2289 = vmatpush1.bf16.msra.mxu0 %v3748_v29  ;;  %v3792_v29 = vld [vmem:[%s4384_s15 + $0xf0] sm:$0xff]  }
 0x973   : > { %2290 = vmatprep.subr.bf16.mxu0 %v3756_v32  ;;  %v3794_v32 = vld [vmem:[%s4384_s15 + $0xb0] sm:$0xff]  }
 0x974   : > { %1975 = vadd.xlane.f32.xlu0 %v1970_v15  ;;  %v4727_v15 = vld [vmem:[%s811_s1] ss:$0 sm:$0xff] }
 0x975   : > { %v2013_v16 = vadd.f32 %v4727_v15, %v2003_v12  ;;  %v2051_v12 = vld [vmem:[%s4378_s2] sm:$0xf] }
 0x976   : > { %2291 = vmatpush1.bf16.msra.mxu0 %v3754_v35  ;;  %v3797_v35 = vld [vmem:[%s4384_s15 + $0x28] sm:$0xff]  }
 0x977   : > { %2292 = vmatprep.subr.bf16.mxu0 %v3762_v39  ;;  %v3801_v39 = vld [vmem:[%s4384_s15 + $0x20] sm:$0xff]  }
 0x97a   : > { %2293 = vmatpush1.bf16.msra.mxu0 %v3760_v38  ;;  %v3800_v38 = vld [vmem:[%s4384_s15 + $0xe0] sm:$0xff]  }
 0x97b   : > { %2294 = vmatprep.subr.bf16.mxu0 %v3768_v42  ;;  %v3803_v42 = vld [vmem:[%s4384_s15 + $0x58] sm:$0xff]  }
 0x97e   : > { %2295 = vmatpush1.bf16.msra.mxu0 %v3766_v45  ;;  %v3805_v45 = vld [vmem:[%s4384_s15 + $0x18] sm:$0xff]  }
 0x97f   : > { %2296 = vmatprep.subr.bf16.mxu0 %v3774_v46  ;;  %v3807_v46 = vld [vmem:[%s4384_s15 + $0x50] sm:$0xff]  }
 0x982   : > { %2297 = vmatpush1.bf16.msra.mxu0 %v3772_v48  ;;  %v3809_v48 = vld [vmem:[%s4384_s15 + $0x10] sm:$0xff]  }
 0x983   : > { %2298 = vmatprep.subr.bf16.mxu0 %v3780_v50  ;;  %v3811_v50 = vld [vmem:[%s4384_s15 + $0x48] sm:$0xff]  }
 0x986   : > { %2299 = vmatpush1.bf16.msra.mxu0 %v3778_v28  ;;  %v3813_v28 = vld [vmem:[%s4384_s15 + $0x8] sm:$0xff]  }
 0x987   : > { %2300 = vmatprep.subr.bf16.mxu0 %v3786_v53  ;;  %v3815_v53 = vld [vmem:[%s4384_s15 + $0x40] sm:$0xff]  }
 0x98a   : > { %2301 = vmatpush1.bf16.msra.mxu0 %v3784_v5  ;;  %v3817_v5 = vld [vmem:[%s4384_s15] sm:$0xff]  }
 0x98b   : > { %3434 = vmatprep.subr.bf16.mxu0 %v3788_v19 }
 0x9f5   : > { %v1958_v7 = vpop.xlane.xlu0 %1957 }
 0x9f6   : > { %v1963_v58 = vmul.f32 0.0078125, %v1958_v7 }
 0x9f8   : > { %v4703_v2 = vsub.f32 %v4657_v59, %v1963_v58 }
 0x9f9   : > { %v1960_v8 = vpop.xlane.xlu0 %1959 }
 0x9fa   : > { %v1964_v9 = vmul.f32 0.0078125, %v1960_v8  ;;  %v1971_v61 = vmul.f32 %v4703_v2, %v4703_v2 }
 0x9fc   : > { %v4708_v62 = vsub.f32 %v4665_v14, %v1964_v9  ;;  %1977 = vadd.xlane.f32.xlu0 %v1971_v61 }
 0x9fd   : > { %v1976_v63 = vpop.xlane.xlu0 %1975 }
 0x9fe   : > { %v1982_v0 = vmul.f32 0.0078125, %v1976_v63  ;;  %v1972_v55 = vmul.f32 %v4708_v62, %v4708_v62 }
 0xa00   : > { %v1986_v1 = vadd.f32 1e-05, %v1982_v0  ;;  %1979 = vadd.xlane.f32.xlu0 %v1972_v55 }
 0xa02   : > { %3861 = vrsqrt.f32 %v1986_v1 }
 0xa0f   : > { %v3862_v10 = vpop.eup %3861 }
 0xa10   : > { %v1994_v11 = vmul.f32 %v3862_v10, %v4662_v13  ;;  %v3787_v13 = vld [vmem:[%s4384_s15 + $0x78] sm:$0xff]  }
 0xa11   : > { %3406 = vmatprep.subr.bf16.mxu1 %v3787_v13 }
 0xa12   : > { %v2004_v41 = vmul.f32 %v4718_v6, %v1994_v11 }
 0xa14   : > { %v2014_v17 = vadd.f32 %v4727_v15, %v2004_v41  ;;  %v2067_v41 = vsub.s32 3, %v4460_v20 }
 0xa16   : > { %v2017_v18 = vpack.c.bf16 %v2014_v17, %v2013_v16  ;;  %v4786_v16 = vrot.slane %v2051_v12, %v2067_v41 }
 0xa18   : > { %2266 = vmatmul.mubr.bf16.vlgmr.msra.gmra.mxu1 %v2017_v18  ;;  %2319 = vmatmul.mubr.bf16.vlgmr.msra.gmra.mxu0 %v2017_v18 }
 0xa19   : > { %2275 = vmatprep.mubr.bf16.mxu1 %v4106_v33  ;;  %2328 = vmatprep.mubr.bf16.mxu0 %v4106_v33  ;;  %v3795_v33 = vld [vmem:[%s4384_s15 + $0x68] sm:$0xff]   ;;  %s2802_s15 = scalar_lea.vmem (!%p3338_p1), [#allocation2], %s2801_s17  ;;  %s4948_s17 = sld [smem:[#allocation33_spill]] (!%p3338_p1) }
 0xa1a   : > { %3407 = vmatpush3.bf16.msra.mxu1 %v3789_v22  ;;  %3435 = vmatpush3.bf16.msra.mxu0 %v3790_v25 }
 0xa1b   : > { %3408 = vmatprep.subr.bf16.mxu1 %v3791_v26  ;;  %3436 = vmatprep.subr.bf16.mxu0 %v3792_v29 }
 0xa1e   : > { %3409 = vmatpush3.bf16.msra.mxu1 %v3793_v30  ;;  %3437 = vmatpush3.bf16.msra.mxu0 %v3794_v32 }
 0xa1f   : > { %3410 = vmatprep.subr.bf16.mxu1 %v3795_v33  ;;  %3438 = vmatprep.subr.bf16.mxu0 %v3796_v34 }
 0xa22   : > { %3411 = vmatpush3.bf16.msra.mxu1 %v3797_v35  ;;  %3439 = vmatpush3.bf16.msra.mxu0 %v3798_v36 }
 0xa23   : > { %3412 = vmatprep.subr.bf16.mxu1 %v3799_v37  ;;  %3440 = vmatprep.subr.bf16.mxu0 %v3800_v38 }
 0xa26   : > { %3413 = vmatpush3.bf16.msra.mxu1 %v3801_v39  ;;  %3441 = vmatpush3.bf16.msra.mxu0 %v3802_v40 }
 0xa27   : > { %3414 = vmatprep.subr.bf16.mxu1 %v3803_v42  ;;  %3442 = vmatprep.subr.bf16.mxu0 %v3804_v44 }
 0xa2a   : > { %3415 = vmatpush3.bf16.msra.mxu1 %v3805_v45  ;;  %3443 = vmatpush3.bf16.msra.mxu0 %v3806_v52 }
 0xa2b   : > { %3416 = vmatprep.subr.bf16.mxu1 %v3807_v46  ;;  %3444 = vmatprep.subr.bf16.mxu0 %v3808_v47 }
 0xa2e   : > { %3417 = vmatpush3.bf16.msra.mxu1 %v3809_v48  ;;  %3445 = vmatpush3.bf16.msra.mxu0 %v3810_v49 }
 0xa2f   : > { %3418 = vmatprep.subr.bf16.mxu1 %v3811_v50  ;;  %3446 = vmatprep.subr.bf16.mxu0 %v3812_v23 }
 0xa32   : > { %3419 = vmatpush3.bf16.msra.mxu1 %v3813_v28  ;;  %3447 = vmatpush3.bf16.msra.mxu0 %v3814_v51 }
 0xa33   : > { %3420 = vmatprep.subr.bf16.mxu1 %v3815_v53  ;;  %3448 = vmatprep.subr.bf16.mxu0 %v3816_v56 }
 0xa36   : > { %3421 = vmatpush3.bf16.msra.mxu1 %v3817_v5  ;;  %3449 = vmatpush3.bf16.msra.mxu0 %v3818_v57 }
 0xa85   : > { %v1978_v54 = vpop.xlane.xlu0 %1977 }
 0xa86   : > { %v1983_v7 = vmul.f32 0.0078125, %v1978_v54 }
 0xa88   : > { %v1987_v58 = vadd.f32 1e-05, %v1983_v7 }
 0xa89   : > { %v1980_v60 = vpop.xlane.xlu0 %1979 }
 0xa8a   : > { %3863 = vrsqrt.f32 %v1987_v58  ;;  %v1984_v8 = vmul.f32 0.0078125, %v1980_v60 }
 0xa8c   : > { %v1988_v9 = vadd.f32 1e-05, %v1984_v8 }
 0xa8e   : > { %3865 = vrsqrt.f32 %v1988_v9 }
 0xa97   : > { %v3864_v61 = vpop.eup %3863 }
 0xa98   : > { %v1995_v63 = vmul.f32 %v3864_v61, %v4703_v2  ;;  %v4776_v2 = vrot.slane %v2051_v12, %v942_v21 }
 0xa9a   : > { %v2005_v1 = vmul.f32 %v4718_v6, %v1995_v63 }
 0xa9b   : > { %v3866_v0 = vpop.eup %3865 }
 0xa9c   : > { %v1996_v55 = vmul.f32 %v3866_v0, %v4708_v62  ;;  %v2015_v4 = vadd.f32 %v4727_v15, %v2005_v1  ;;  %v4780_v62 = vrot.slane %v2051_v12, %v950_v43 }
 0xa9e   : > { %v2006_v3 = vmul.f32 %v4718_v6, %v1996_v55  ;;  %v4784_v6 = vrot.slane %v2051_v12, %v946_v24 }
 0xaa0   : > { %v2016_v10 = vadd.f32 %v4727_v15, %v2006_v3 }
 0xaa2   : > { %v2018_v11 = vpack.c.bf16 %v2016_v10, %v2015_v4 }
 0xaa4   : > { %2276 = vmatmul.mubr.bf16.gmra.mxu1 %v2018_v11  ;;  %2329 = vmatmul.mubr.bf16.gmra.mxu0 %v2018_v11 }
 0xad8   : > { %v2267_v15 = vpop.f32.mrf.mxu1  ;;  %v2320_v17 = vpop.f32.mrf.mxu0 }
 0xad9   : > { %v2268_v18 = vadd.f32 %v2267_v15, %v4776_v2  ;;  %v2321_v13 = vadd.f32 %v2320_v17, %v4780_v62 }
 0xada   : > { %v2269_v19 = vpop.f32.mrf.mxu1  ;;  %v2322_v22 = vpop.f32.mrf.mxu0 }
 0xadb   : > { %v2339_v21 = vmul.f32 0.851, %v2268_v18  ;;  %v2341_v25 = vmul.f32 0.851, %v2321_v13  ;;  %v2270_v26 = vadd.f32 %v2269_v19, %v4784_v6  ;;  %v2323_v43 = vadd.f32 %v2322_v22, %v4786_v16 }
 0xadc   : > { %v2271_v29 = vpop.f32.mrf.mxu1  ;;  %v2324_v30 = vpop.f32.mrf.mxu0 }
 0xadd   : > { %3867 = vtanh.f32 %v2339_v21  ;;  %v2340_v24 = vmul.f32 0.851, %v2270_v26  ;;  %v2342_v32 = vmul.f32 0.851, %v2323_v43  ;;  %v2272_v33 = vadd.f32 %v2271_v29, %v4776_v2 }
 0xade   : > { %3869 = vtanh.f32 %v2341_v25  ;;  %v2325_v34 = vadd.f32 %v2324_v30, %v4780_v62  ;;  %v2273_v35 = vpop.f32.mrf.mxu1  ;;  %v2326_v36 = vpop.f32.mrf.mxu0 }
 0xadf   : > { %3871 = vtanh.f32 %v2340_v24  ;;  %v2343_v37 = vmul.f32 0.851, %v2272_v33  ;;  %v2274_v38 = vadd.f32 %v2273_v35, %v4784_v6  ;;  %v2327_v39 = vadd.f32 %v2326_v36, %v4786_v16 }
 0xae0   : > { %3873 = vtanh.f32 %v2342_v32  ;;  %v2345_v40 = vmul.f32 0.851, %v2325_v34 }
 0xae1   : > { %3875 = vtanh.f32 %v2343_v37  ;;  %v2344_v42 = vmul.f32 0.851, %v2274_v38  ;;  %v2346_v44 = vmul.f32 0.851, %v2327_v39 }
 0xae2   : > { %3877 = vtanh.f32 %v2345_v40 }
 0xae3   : > { %3879 = vtanh.f32 %v2344_v42 }
 0xae4   : > { %3881 = vtanh.f32 %v2346_v44 }
 0xaea   : > { %v3868_v45 = vpop.eup %3867 }
 0xaeb   : > { %v3870_v52 = vpop.eup %3869  ;;  %v2371_v50 = vadd.f32 1.0, %v3868_v45 }
 0xaec   : > { %v3872_v46 = vpop.eup %3871  ;;  %v2373_v51 = vadd.f32 1.0, %v3870_v52 }
 0xaed   : > { %v3874_v47 = vpop.eup %3873  ;;  %v2372_v48 = vadd.f32 1.0, %v3872_v46  ;;  %v2387_v60 = vmul.f32 0.5, %v2371_v50 }
 0xaee   : > { %v3876_v49 = vpop.eup %3875  ;;  %v2374_v23 = vadd.f32 1.0, %v3874_v47  ;;  %v2389_v63 = vmul.f32 0.5, %v2373_v51 }
 0xaef   : > { %v3878_v28 = vpop.eup %3877  ;;  %v2375_v53 = vadd.f32 1.0, %v3876_v49  ;;  %v2388_v54 = vmul.f32 0.5, %v2372_v48  ;;  %v2403_v11 = vmul.f32 %v2387_v60, %v2268_v18 }
 0xaf0   : > { %v3880_v56 = vpop.eup %3879  ;;  %v2377_v5 = vadd.f32 1.0, %v3878_v28  ;;  %v2390_v8 = vmul.f32 0.5, %v2374_v23  ;;  %v2405_v15 = vmul.f32 %v2389_v63, %v2321_v13 }
 0xaf1   : > { %v3882_v57 = vpop.eup %3881  ;;  %v2391_v7 = vmul.f32 0.5, %v2375_v53  ;;  %v2376_v58 = vadd.f32 1.0, %v3880_v56  ;;  %v2404_v3 = vmul.f32 %v2388_v54, %v2270_v26 }
 0xaf2   : > { %v2393_v9 = vmul.f32 0.5, %v2377_v5  ;;  %v2378_v61 = vadd.f32 1.0, %v3882_v57  ;;  %v2406_v12 = vmul.f32 %v2390_v8, %v2323_v43 }
 0xaf3   : > { %v2392_v0 = vmul.f32 0.5, %v2376_v58  ;;  %v2407_v55 = vmul.f32 %v2391_v7, %v2272_v33 }
 0xaf4   : > { %v2394_v1 = vmul.f32 0.5, %v2378_v61  ;;  %v2409_v4 = vmul.f32 %v2393_v9, %v2325_v34 }
 0xaf5   : > { %v2408_v10 = vmul.f32 %v2392_v0, %v2274_v38  ;;  %v2419_v19 = vpack.c.bf16 %v2407_v55, %v2403_v11 }
 0xaf6   : > { %v2410_v41 = vmul.f32 %v2394_v1, %v2327_v39  ;;  %v2421_v21 = vpack.c.bf16 %v2409_v4, %v2405_v15 }
 0xaf7   : > { %v2420_v17 = vpack.c.bf16 %v2408_v10, %v2404_v3 }
 0xaf8   : > { %v2422_v22 = vpack.c.bf16 %v2410_v41, %v2406_v12 }
 0xaf9   : > { %2722 = vmatprep.mubr.bf16.mxu1 %v2420_v17 }
 0xafa   : > { %2771 = vmatprep.mubr.bf16.mxu0 %v2422_v22  ;;  %2723 = vmatmul.mubr.bf16.vlgmr.msra.gmra.mxu1 %v2419_v19 }
 0xafb   : > { %2772 = vmatmul.mubr.bf16.vlgmr.msra.gmra.mxu0 %v2421_v21 }
 0xb64   : > { %v2277_v25 = vpop.f32.mrf.mxu1  ;;  %v2330_v29 = vpop.f32.mrf.mxu0 }
 0xb65   : > { %v2278_v30 = vadd.f32 %v2277_v25, %v4776_v2  ;;  %v2331_v26 = vadd.f32 %v2330_v29, %v4780_v62 }
 0xb66   : > { %v2279_v24 = vpop.f32.mrf.mxu1  ;;  %v2332_v32 = vpop.f32.mrf.mxu0 }
 0xb67   : > { %v2347_v18 = vmul.f32 0.851, %v2278_v30  ;;  %v2349_v43 = vmul.f32 0.851, %v2331_v26  ;;  %v2280_v13 = vadd.f32 %v2279_v24, %v4784_v6  ;;  %v2333_v33 = vadd.f32 %v2332_v32, %v4786_v16  ;;  %v3305_v32 = vld [vmem:[%s818_s24] ss:$0 sm:$0xff] }
 0xb68   : > { %v2281_v34 = vpop.f32.mrf.mxu1  ;;  %v2334_v35 = vpop.f32.mrf.mxu0  ;;  %s3339_s24 = sld [smem:[#allocation4 + $0x1]] (!%p3338_p1) }
 0xb69   : > { %3883 = vtanh.f32 %v2347_v18  ;;  %v2348_v36 = vmul.f32 0.851, %v2280_v13  ;;  %v2350_v37 = vmul.f32 0.851, %v2333_v33  ;;  %v2282_v38 = vadd.f32 %v2281_v34, %v4776_v2 }
 0xb6a   : > { %3885 = vtanh.f32 %v2349_v43  ;;  %v2335_v39 = vadd.f32 %v2334_v35, %v4780_v62  ;;  %v2283_v40 = vpop.f32.mrf.mxu1  ;;  %v2336_v42 = vpop.f32.mrf.mxu0 }
 0xb6b   : > { %3887 = vtanh.f32 %v2348_v36  ;;  %v2351_v44 = vmul.f32 0.851, %v2282_v38  ;;  %v2284_v45 = vadd.f32 %v2283_v40, %v4784_v6  ;;  %v2337_v52 = vadd.f32 %v2336_v42, %v4786_v16 }
 0xb6c   : > { %3889 = vtanh.f32 %v2350_v37  ;;  %v2353_v46 = vmul.f32 0.851, %v2335_v39 }
 0xb6d   : > { %3891 = vtanh.f32 %v2351_v44  ;;  %v2352_v47 = vmul.f32 0.851, %v2284_v45  ;;  %v2354_v48 = vmul.f32 0.851, %v2337_v52 }
 0xb6e   : > { %3893 = vtanh.f32 %v2353_v46  ;;  %s3092_s18 = scalar_lea.vmem (!%p3338_p1), [#allocation2], %s3339_s24 }
 0xb6f   : > { %3895 = vtanh.f32 %v2352_v47 }
 0xb70   : > { %3897 = vtanh.f32 %v2354_v48 }
 0xb76   : > { %v3884_v2 = vpop.eup %3883 }
 0xb77   : > { %v3886_v49 = vpop.eup %3885  ;;  %v2379_v51 = vadd.f32 1.0, %v3884_v2 }
 0xb78   : > { %v3888_v50 = vpop.eup %3887  ;;  %v2381_v6 = vadd.f32 1.0, %v3886_v49 }
 0xb79   : > { %v3890_v62 = vpop.eup %3889  ;;  %v2380_v23 = vadd.f32 1.0, %v3888_v50  ;;  %v2395_v8 = vmul.f32 0.5, %v2379_v51 }
 0xb7a   : > { %v3892_v28 = vpop.eup %3891  ;;  %v2382_v53 = vadd.f32 1.0, %v3890_v62  ;;  %v2397_v0 = vmul.f32 0.5, %v2381_v6 }
 0xb7b   : > { %v3894_v56 = vpop.eup %3893  ;;  %v2383_v5 = vadd.f32 1.0, %v3892_v28  ;;  %v2396_v7 = vmul.f32 0.5, %v2380_v23  ;;  %v2411_v12 = vmul.f32 %v2395_v8, %v2278_v30 }
 0xb7c   : > { %v3896_v16 = vpop.eup %3895  ;;  %v2385_v57 = vadd.f32 1.0, %v3894_v56  ;;  %v2398_v9 = vmul.f32 0.5, %v2382_v53  ;;  %v2413_v17 = vmul.f32 %v2397_v0, %v2331_v26 }
 0xb7d   : > { %v3898_v54 = vpop.eup %3897  ;;  %v2399_v58 = vmul.f32 0.5, %v2383_v5  ;;  %v2384_v60 = vadd.f32 1.0, %v3896_v16  ;;  %v2412_v4 = vmul.f32 %v2396_v7, %v2280_v13 }
 0xb7e   : > { %v2401_v61 = vmul.f32 0.5, %v2385_v57  ;;  %v2386_v63 = vadd.f32 1.0, %v3898_v54  ;;  %v2414_v41 = vmul.f32 %v2398_v9, %v2333_v33 }
 0xb7f   : > { %v2400_v55 = vmul.f32 0.5, %v2384_v60  ;;  %v2415_v1 = vmul.f32 %v2399_v58, %v2282_v38 }
 0xb80   : > { %v2402_v3 = vmul.f32 0.5, %v2386_v63  ;;  %v2417_v10 = vmul.f32 %v2401_v61, %v2335_v39 }
 0xb81   : > { %v2416_v11 = vmul.f32 %v2400_v55, %v2284_v45  ;;  %v2423_v21 = vpack.c.bf16 %v2415_v1, %v2411_v12 }
 0xb82   : > { %v2418_v15 = vmul.f32 %v2402_v3, %v2337_v52  ;;  %v2425_v25 = vpack.c.bf16 %v2417_v10, %v2413_v17 }
 0xb83   : > { %v2424_v19 = vpack.c.bf16 %v2416_v11, %v2412_v4 }
 0xb84   : > { %v2426_v22 = vpack.c.bf16 %v2418_v15, %v2414_v41 }
 0xb85   : > { %2730 = vmatprep.mubr.bf16.mxu1 %v2424_v19 }
 0xb86   : > { %2779 = vmatprep.mubr.bf16.mxu0 %v2426_v22  ;;  %2731 = vmatmul.mubr.bf16.gmra.mxu1 %v2423_v21 }
 0xb87   : > { %2780 = vmatmul.mubr.bf16.gmra.mxu0 %v2425_v25 }
 0xbba   : > { %v3422_v29 = vpop.f32.mrf.mxu1 }
 0xbbb   : > { %v3450_v24 = vpop.f32.mrf.mxu0 }
 0xbbc   : > { %v3423_v18 = vpop.f32.mrf.mxu1 }
 0xbbd   : > { %v3424_v30 = vadd.f32 %v3423_v18, %v3422_v29  ;;  %v3451_v43 = vpop.f32.mrf.mxu0 }
 0xbbe   : > { %v3425_v13 = vpop.f32.mrf.mxu1  ;;  %v3452_v33 = vadd.f32 %v3451_v43, %v3450_v24 }
 0xbbf   : > { %v2725_v26 = vadd.f32 %v3424_v30, %v3305_v32  ;;  %v3453_v34 = vpop.f32.mrf.mxu0 }
 0xbc0   : > { %v3426_v35 = vpop.f32.mrf.mxu1 }
 0xbc1   : > { %v2774_v36 = vadd.f32 %v3452_v33, %v2725_v26  ;;  %v3427_v37 = vadd.f32 %v3426_v35, %v3425_v13  ;;  %v3454_v38 = vpop.f32.mrf.mxu0 }
 0xbc2   : > { %v3455_v42 = vadd.f32 %v3454_v38, %v3453_v34 }
 0xbc3   : > { %v2788_v39 = vadd.f32 %v2774_v36, %v4624_v27  ;;  %v2728_v40 = vadd.f32 %v3427_v37, %v3305_v32 }
 0xbc5   : > { %2792 = vst [vmem:[#allocation2] sm:$0xff] %v2788_v39  ;;  %v2777_v44 = vadd.f32 %v3455_v42, %v2728_v40 }
 0xbc7   : > { %v2789_v45 = vadd.f32 %v2777_v44, %v4628_v31 }
 0xbc9   : > { %2793 = vst [vmem:[#allocation2 + $0x8] sm:$0xff] %v2789_v45 }
 0xc46   : > { %v3428_v52 = vpop.f32.mrf.mxu1 }
 0xc47   : > { %v3456_v46 = vpop.f32.mrf.mxu0 }
 0xc48   : > { %v3429_v47 = vpop.f32.mrf.mxu1 }
 0xc49   : > { %v3430_v48 = vadd.f32 %v3429_v47, %v3428_v52  ;;  %v3457_v2 = vpop.f32.mrf.mxu0 }
 0xc4a   : > { %v3431_v49 = vpop.f32.mrf.mxu1  ;;  %v3458_v62 = vadd.f32 %v3457_v2, %v3456_v46 }
 0xc4b   : > { %v2733_v50 = vadd.f32 %v3430_v48, %v3305_v32  ;;  %v3459_v23 = vpop.f32.mrf.mxu0 }
 0xc4c   : > { %v3432_v28 = vpop.f32.mrf.mxu1 }
 0xc4d   : > { %v2782_v51 = vadd.f32 %v3458_v62, %v2733_v50  ;;  %v3433_v53 = vadd.f32 %v3432_v28, %v3431_v49  ;;  %v3460_v27 = vpop.f32.mrf.mxu0 }
 0xc4e   : > { %v3461_v5 = vadd.f32 %v3460_v27, %v3459_v23 }
 0xc4f   : > { %v2790_v56 = vadd.f32 %v2782_v51, %v4657_v59  ;;  %v2736_v6 = vadd.f32 %v3433_v53, %v3305_v32 }
 0xc51   : > { %2794 = vst [vmem:[#allocation2 + $0x10] sm:$0xff] %v2790_v56  ;;  %v2785_v31 = vadd.f32 %v3461_v5, %v2736_v6  ;;  %2799 = sbr.rel (%p3338_p1) target bundleno = 3833 (0xef9), region = 108 }
 0xc53   : > { %v2791_v16 = vadd.f32 %v2785_v31, %v4665_v14 }
 0xc55   : > { %2795 = vst [vmem:[#allocation2 + $0x18] sm:$0xff] %v2791_v16 }
 0xc56   : > { %vm2812_vm3 = vcmask 1040384   ;;  %vm2816_vm4 = vcmask 1041408   ;;  %v3902_v14 = vld [vmem:[%s4946_s20 + $0x38] sm:$0xff]   ;;  %v4110_v60 = vmov 0.0   ;;  %v3903_v8 = vld [vmem:[%s4947_s9 + $0x30] sm:$0xff]   ;;  %v3904_v1 = vld [vmem:[%s4947_s9 + $0x28] sm:$0xff]  }
 0xc57   : > { %3587 = vmatprep.subr.bf16.mxu0 %v4110_v60  ;;  %v3905_v3 = vld [vmem:[%s4947_s9 + $0x20] sm:$0xff]   ;;  %vm4111_vm5 = vmmov 0   ;;  %v3906_v4 = vld [vmem:[%s4947_s9 + $0x18] sm:$0xff]   ;;  %v3907_v10 = vld [vmem:[%s4947_s9 + $0x10] sm:$0xff]   ;;  %v4112_v35 = vmov 1966171168  }
 0xc58   : > { %3588 = vmatpush3.bf16.msra.mxu0 %v3902_v14  ;;  %3603 = vmatprep.mubr.msk.bf16.mxu0 %vm4111_vm5, %v4110_v60  ;;  %v3908_v11 = vld [vmem:[%s4947_s9 + $0x8] sm:$0xff]   ;;  %v3909_v12 = vld [vmem:[%s4947_s9] sm:$0xff]   ;;  %v2957_v36 = vunpack.c.l.s4 %v4112_v35 }
 0xc59   : > { %3589 = vmatprep.subr.bf16.mxu0 %v4110_v60  ;;  %v3341_v22 = vld [vmem:[%s4948_s17] ss:$0 sm:$0xff] }
 0xc5a   : > { %v2958_v37 = vunpack.c.0.s8 %v2957_v36 }
 0xc5c   : > { %v2803_v57 = vld [vmem:[%s2802_s15] sm:$0x1]  ;;  %v3340_v54 = vld [vmem:[%s3092_s18 + $0x10] sm:$0x1]  ;;  %3590 = vmatpush3.bf16.msra.mxu0 %v3903_v8  ;;  %s4949_s18 = sld [smem:[#allocation34_spill]]  ;;  %v2961_v38 = vsub.s32 %v2958_v37, %v4460_v20 }
 0xc5d   : > { %v2810_v7 = vrot.slane %v3340_v54, 7  ;;  %3591 = vmatprep.subr.bf16.mxu0 %v4110_v60 }
 0xc5f   : > { %v2813_v59 = vsel %vm2812_vm3, %v2803_v57, %v2810_v7 }
 0xc60   : > { %v2817_v58 = vsel %vm2816_vm4, %v2813_v59, 0.0  ;;  %3592 = vmatpush3.bf16.msra.mxu0 %v3904_v1 }
 0xc61   : > { %2818 = vadd.xlane.f32.xlu0 %v2817_v58  ;;  %3593 = vmatprep.subr.bf16.mxu0 %v4110_v60 }
 0xc62   : > { %v3342_v25 = vld [vmem:[%s4949_s18] ss:$0 sm:$0xff] }
 0xc64   : > { %3594 = vmatpush3.bf16.msra.mxu0 %v3905_v3 }
 0xc65   : > { %3595 = vmatprep.subr.bf16.mxu0 %v4110_v60 }
 0xc68   : > { %3596 = vmatpush3.bf16.msra.mxu0 %v3906_v4 }
 0xc69   : > { %3597 = vmatprep.subr.bf16.mxu0 %v4110_v60 }
 0xc6c   : > { %3598 = vmatpush3.bf16.msra.mxu0 %v3907_v10 }
 0xc6d   : > { %3599 = vmatprep.subr.bf16.mxu0 %v4110_v60 }
 0xc70   : > { %3600 = vmatpush3.bf16.msra.mxu0 %v3908_v11 }
 0xc71   : > { %3601 = vmatprep.subr.bf16.mxu0 %v4110_v60 }
 0xc74   : > { %3602 = vmatpush3.bf16.msra.mxu0 %v3909_v12 }
 0xcea   : > { %v2819_v9 = vpop.xlane.xlu0 %2818 }
 0xceb   : > { %v2820_v61 = vmul.f32 0.0078125, %v2819_v9 }
 0xced   : > { %v2821_v63 = vsub.f32 %v2813_v59, %v2820_v61 }
 0xcef   : > { %v2822_v0 = vmul.f32 %v2821_v63, %v2821_v63 }
 0xcf1   : > { %v2823_v55 = vsel %vm2816_vm4, %v2822_v0, 0.0 }
 0xcf2   : > { %2824 = vadd.xlane.f32.xlu0 %v2823_v55 }
 0xd7b   : > { %v2825_v41 = vpop.xlane.xlu0 %2824 }
 0xd7c   : > { %v2826_v15 = vmul.f32 0.0078125, %v2825_v41 }
 0xd7e   : > { %v2827_v17 = vadd.f32 1e-05, %v2826_v15 }
 0xd80   : > { %3910 = vrsqrt.f32 %v2827_v17 }
 0xd8d   : > { %v3911_v19 = vpop.eup %3910 }
 0xd8e   : > { %v2829_v21 = vmul.f32 %v3911_v19, %v2821_v63 }
 0xd90   : > { %v2836_v29 = vmul.f32 %v3341_v22, %v2829_v21 }
 0xd92   : > { %v2843_v24 = vadd.f32 %v3342_v25, %v2836_v29 }
 0xd94   : > { %v2844_v32 = vpack.c.bf16 %v2843_v24, %v2843_v24 }
 0xd96   : > { %3604 = vmatmul.mubr.bf16.vlgmr.msra.gmra.mxu0 %v2844_v32 }
 0xe56   : > { %v2943_v18 = vpop.f32.mrf.mxu0 }
 0xe57   : > { %v2949_v30 = vmul.f32 %v2943_v18, %v2943_v18 }
 0xe58   : > { %v3605_v43 = vpop.f32.mrf.mxu0 }
 0xe59   : > { %v2950_v13 = vsel %vm2816_vm4, %v2949_v30, 0.0 }
 0xe5a   : > { %2951 = vadd.xlane.f32.xlu1 %v2950_v13  ;;  %v2946_v26 = vpop.f32.mrf.mxu0 }
 0xe5c   : > { %v3606_v33 = vpop.f32.mrf.mxu0 }
 0xee3   : > { %v2952_v34 = vpop.xlane.xlu1 %2951 }
 0xee4   : > { %3912 = vrsqrt.f32 %v2952_v34 }
 0xef1   : > { %v3913_v39 = vpop.eup %3912 }
 0xef2   : > { %v2954_v40 = vmul.f32 %v3913_v39, %v2943_v18 }
 0xef4   : > { %v2962_v42 = vrot.slane %v2954_v40, %v2961_v38 }
 0xef6   : > { %v2963_v44 = vcombine.high %v2962_v42, %v2962_v42  ;;  %3351 = vst.sshfl [vmem:[#allocation11] sm:$0x1 pattern:$0x73625140] %v2962_v42 }
 0xef8   : > { %3352 = vst.sshfl [vmem:[#allocation11 + $0x1] sm:$0x1 pattern:$0x73625140] %v2963_v44 }
 0xef9 PF: > { %p3632_p11 = scmp.eq.s32.totalorder %s4243_s12, 1  ;;  %s4113_s23 = smov [#allocation11]  }
 0xefa   : > { %s2991_s30 = sshll.u32 %s4113_s23, 4  ;;  %s2992_s30 = int_to_ptr.vmem [resolvable:$true] %s2991_s30 }
 0xefb   : > { %s4010_s20 = scalar_lea.vmem %s2992_s30, 32  ;;  %p4017_p8 = scmp.lt.s32.totalorder %s2992_s30, %s2992_s30 }
 0xefc   : > { %p4011_p5 = scmp.ne.s32.totalorder %s2992_s30, %s4010_s20  ;;  %p4018_p9 = scmp.lt.s32.totalorder %s4010_s20, %s4010_s20 }
 0xefe   : > { %p4012_p6 = pnand %p4011_p5, %p3632_p11  ;;  %p4019_p10 = por %p4018_p9, %p4017_p8 }
 0xf00   : > { %p4013_p7 = pneg %p4012_p6 }
 0xf02   : > { %p4020_p13 = pnand %p4019_p10, %p4013_p7 }
 0xf04   : > { %4023 = shalt.err (!%p4020_p13)
}
 0xf05   : > { %s4114_s21 = smov 16   ;;  %s4115_s5 = smov 1  }
 0xf06   : > { %s4950_s19 = sld [smem:[#allocation36_spill]] }
 0xf0c   : > { %3618 = dma.vmem_to_hbm [thread:$0]  (%p3632_p11), %s2992_s30, 32, %s4950_s19, [#allocation7], %s4114_s21, %s4114_s21, %s4115_s5  }
 0xf0d   : > { %4069 = dma.done.wait (%p3632_p11), [#allocation7], 32  }
 0xf0e   : > { %4071 = vsyncadd (%p3632_p11), [#allocation7], 4294967264 }
 0xf0f PF: > { %s4951_s28 = sld [smem:[#allocation19_spill]] }
 0xf10   : > { %s4952_s19 = sld [smem:[#allocation16_spill]] }
 0xf11   : > { %s4953_s1 = sld [smem:[#allocation17_spill]] }
 0xf12   : > { %s4954_s20 = sld [smem:[#allocation21_spill]] }
 0xf13   : > { %s4955_s21 = sld [smem:[#allocation18_spill]] }
 0xf14   : > { %s4956_s22 = sld [smem:[#allocation20_spill]] }
 0xf15   : > { %s41_s2 = sadd.s32 1, %s4951_s28  }
 0xf16   : > { %p38_p2 = scmp.ge.s32.totalorder %s41_s2, 4  }
 0xf18   :  { %40 = sbr.rel (!%p38_p2) target bundleno = 43 (0x2b), region = 191 }
 0xf1d   :  { %3007 = vsyncpa [#allocation6], 1 }
 0xf1e   :  { %3009 = vsyncpa [#allocation6 + $0x1], 1 }
 0xf1f   :  { %3010 = vsyncpa [#allocation9], 1 }
 0xf20   :  { %3012 = vsyncpa [#allocation9 + $0x1], 1 }
 0xf21   :  { %3013 = vsyncpa [#allocation7], 1 }
 0xf22   :  { %3015 = vsyncpa [#allocation7 + $0x1], 1 }

</bundles_post_ra>
